<compile_context>
chip_gen: v7x
topology: tpu7x:2x2x1
jax: 0.10.0
libtpu: 0.0.40
codegen_flags: <defaults>
</compile_context>

<pallas_src>
import numpy as np
import jax
import jax.numpy as jnp
from jax.experimental import pallas as pl
from jax.experimental.pallas import tpu as pltpu


_VMEM = pl.BlockSpec(memory_space=pltpu.MemorySpace.VMEM)


# ----------------------------------------------------------------------------
# Pallas kernels
# ----------------------------------------------------------------------------
def _conv_stage_kernel(p9_ref, mask_ref, wb_ref, bb_ref, wc_ref, bc_ref, o_ref):
    """Branch convs + ReLU + conv1 + ReLU, all as MXU matmuls.

    p9:   (R, 81)   bf16  9x9 im2col patches of the single-channel input
    mask: (R, 225)  f32   per-row validity of each of conv1's 9 taps
    wb:   (81, 225) bf16  branch weights scattered per tap (tap-major cols)
    bb:   (1, 225)  f32
    wc:   (225, 12) bf16  conv1 weights, rows ordered (tap, channel)
    bc:   (1, 12)   f32
    o:    (R, 12)   f32   rows = (b, i, j), cols = conv1 channel
    """
    y = jnp.dot(p9_ref[...], wb_ref[...], preferred_element_type=jnp.float32)
    y = jnp.maximum(y + bb_ref[...], 0.0)        # branch ReLU
    y = y * mask_ref[...]                        # conv1's zero-padding of the activation
    h = jnp.dot(y.astype(jnp.bfloat16), wc_ref[...],
                preferred_element_type=jnp.float32)
    o_ref[...] = jnp.maximum(h + bc_ref[...], 0.0)


def _mlp_head_kernel(x_ref, w1_ref, b1_ref, w2_ref, b2_ref, wh_ref, bh_ref, o_ref):
    """linear1 + fc1 + folded dueling head: three chained MXU matmuls."""
    h = jnp.dot(x_ref[...].astype(jnp.bfloat16), w1_ref[...],
                preferred_element_type=jnp.float32)
    h = jnp.maximum(h + b1_ref[...], 0.0)
    h = jnp.dot(h.astype(jnp.bfloat16), w2_ref[...],
                preferred_element_type=jnp.float32)
    h = jnp.maximum(h + b2_ref[...], 0.0)
    q = jnp.dot(h.astype(jnp.bfloat16), wh_ref[...],
                preferred_element_type=jnp.float32)
    o_ref[...] = q + bh_ref[...]


# ----------------------------------------------------------------------------
# One-time weight packing (outside the jitted forward — zero per-call cost)
# ----------------------------------------------------------------------------
def _embed_to7(w, k):
    """Center a (Cout, 1, k, k) conv weight inside a 7x7 kernel (same padding)."""
    off = (7 - k) // 2
    out = jnp.zeros((w.shape[0], 1, 7, 7), w.dtype)
    return out.at[:, :, off:off + k, off:off + k].set(w)


def pack_params(p):
    f32, bf16 = jnp.float32, jnp.bfloat16

    # Combined branch weights as a (7,7,25) kernel stack.
    w7 = jnp.concatenate([_embed_to7(p["w0"], 1), _embed_to7(p["w1"], 3),
                          _embed_to7(p["w2"], 5), _embed_to7(p["w3"], 7)], axis=0)
    b7 = jnp.concatenate([p["b0"], p["b1"], p["b2"], p["b3"]])          # (25,)
    w7_kkc = w7[:, 0].transpose(1, 2, 0)                                # (7,7,25)

    # 9-tap "shifted recompute": tap t = (di+1)*3+(dj+1) evaluates the branch
    # stack at spatial offset (di, dj) from the same 9x9 input patch.
    wb = jnp.zeros((81, 9 * 25), f32)
    for di in (-1, 0, 1):
        for dj in (-1, 0, 1):
            t = (di + 1) * 3 + (dj + 1)
            tap = jnp.zeros((9, 9, 25), f32)
            tap = tap.at[di + 1:di + 8, dj + 1:dj + 8, :].set(w7_kkc)
            wb = wb.at[:, t * 25:(t + 1) * 25].set(tap.reshape(81, 25))
    bb = jnp.tile(b7, 9)                                                # (225,)

    # conv1 weights, rows ordered (ky*3+kx)*25 + c  (matches the tap blocks).
    wc = p["wc1"].transpose(2, 3, 1, 0).reshape(225, 12)

    # linear1 re-permuted so a contiguous HWC reshape of kernel-1's output
    # matches torch's CHW flatten:  row p*12 + c  <-  wl1[:, c*100 + p].
    w1 = p["wl1"].reshape(200, 12, 100).transpose(2, 1, 0).reshape(1200, 200)
    w2 = p["wfc1"].T

    # Dueling head folded into a single linear layer (linear in h):
    #   Q_c = h . (Wa[c] + Wv - mean_c'(Wa[c'])) + (ba_c + bv - mean(ba))
    wh_core = p["wadv"] + p["wval"] - jnp.mean(p["wadv"], axis=0, keepdims=True)
    bh_core = p["badv"] + p["bval"][0] - jnp.mean(p["badv"])
    wh = jnp.zeros((200, 128), f32).at[:, :100].set(wh_core.T)
    bh = jnp.zeros((128,), f32).at[:100].set(bh_core)

    return {
        "wb": wb.astype(bf16), "bb": bb.reshape(1, 225).astype(f32),
        "wc": wc.astype(bf16), "bc": p["bc1"].reshape(1, 12).astype(f32),
        "w1": w1.astype(bf16), "b1": p["bl1"].reshape(1, 200).astype(f32),
        "w2": w2.astype(bf16), "b2": p["bfc1"].reshape(1, 200).astype(f32),
        "wh": wh.astype(bf16), "bh": bh.reshape(1, 128).astype(f32),
    }


def _tap_mask(batch):
    """(batch*100, 225) f32: 1 where conv1 tap (di,dj) lands inside the 10x10 grid."""
    idx = np.arange(10)
    blocks = []
    for di in (-1, 0, 1):
        vi = ((idx + di >= 0) & (idx + di < 10)).astype(np.float32)
        for dj in (-1, 0, 1):
            vj = ((idx + dj >= 0) & (idx + dj < 10)).astype(np.float32)
            v = np.outer(vi, vj).reshape(100)                  # (100,) per position
            blocks.append(np.repeat(v[:, None], 25, axis=1))   # (100, 25) per tap
    m = np.concatenate(blocks, axis=1)                         # (100, 225)
    return np.tile(m, (batch, 1))


# ----------------------------------------------------------------------------
# D3QN forward (2 pallas_calls, no transposes, free reshape between them)
# ----------------------------------------------------------------------------
def d3qn_forward(x, pk):
    x = x.reshape(-1, 10, 10).astype(jnp.float32)
    B = x.shape[0]
    R = B * 100

    # 9x9 im2col of the single-channel input (pad 4): small XLA slice fusion.
    xp = jnp.pad(x, ((0, 0), (4, 4), (4, 4)))
    cols = [xp[:, qy:qy + 10, qx:qx + 10] for qy in range(9) for qx in range(9)]
    p9 = jnp.stack(cols, axis=-1).reshape(R, 81).astype(jnp.bfloat16)

    mask = jnp.asarray(_tap_mask(B), dtype=jnp.float32)   # trace-time constant

    conv_out = pl.pallas_call(
        _conv_stage_kernel,
        out_shape=jax.ShapeDtypeStruct((R, 12), jnp.float32),
        in_specs=[_VMEM] * 6,
        out_specs=_VMEM,
        cost_estimate=pl.CostEstimate(
            flops=2 * R * 81 * 225 + 2 * R * 225 * 12,
            transcendentals=0,
            bytes_accessed=(R * 81 * 2 + R * 225 * 4 + 81 * 225 * 2 + 225 * 4
                            + 225 * 12 * 2 + 12 * 4 + R * 12 * 4)),
    )(p9, mask, pk["wb"], pk["bb"], pk["wc"], pk["bc"])

    # Contiguous reshape: rows (b, p) x cols c  ->  (b, p*12 + c); the matching
    # permutation is already baked into pk["w1"], so no transpose runs here.
    flat = conv_out.reshape(B, 1200)

    q_pad = pl.pallas_call(
        _mlp_head_kernel,
        out_shape=jax.ShapeDtypeStruct((B, 128), jnp.float32),
        in_specs=[_VMEM] * 7,
        out_specs=_VMEM,
        cost_estimate=pl.CostEstimate(
            flops=2 * B * (1200 * 200 + 200 * 200 + 200 * 128),
            transcendentals=0,
            bytes_accessed=(B * 1200 * 4 + 1200 * 200 * 2 + 200 * 200 * 2
                            + 200 * 128 * 2 + (200 + 200 + 128) * 4
                            + B * 128 * 4)),
    )(flat, pk["w1"], pk["b1"], pk["w2"], pk["b2"], pk["wh"], pk["bh"])

    return q_pad[:, :100]   # drop lane padding of the dueling-head output


# ----------------------------------------------------------------------------
# Parameters (deterministic, synthetic — torch layer shapes)
# ----------------------------------------------------------------------------
def init_params(key):
    ks = jax.random.split(key, 18)
    n = lambda k, s, std: std * jax.random.normal(k, s, jnp.float32)
    p = {}
    p["w0"] = n(ks[0], (1, 1, 1, 1), 0.5);     p["b0"] = n(ks[1], (1,), 0.1)
    p["w1"] = n(ks[2], (8, 1, 3, 3), 0.3);     p["b1"] = n(ks[3], (8,), 0.1)
    p["w2"] = n(ks[4], (8, 1, 5, 5), 0.2);     p["b2"] = n(ks[5], (8,), 0.1)
    p["w3"] = n(ks[6], (8, 1, 7, 7), 0.15);    p["b3"] = n(ks[7], (8,), 0.1)
    p["wc1"] = n(ks[8], (12, 25, 3, 3), 0.05); p["bc1"] = n(ks[9], (12,), 0.1)
    p["wl1"] = n(ks[10], (200, 1200), 0.03);   p["bl1"] = n(ks[11], (200,), 0.1)
    p["wfc1"] = n(ks[12], (200, 200), 0.1);    p["bfc1"] = n(ks[13], (200,), 0.1)
    p["wadv"] = n(ks[14], (100, 200), 0.1);    p["badv"] = n(ks[15], (100,), 0.05)
    p["wval"] = n(ks[16], (1, 200), 0.2);      p["bval"] = n(ks[17], (1,), 0.05)
    return p


# ----------------------------------------------------------------------------
# Pure-JAX reference (f32, original unpacked weights)
# ----------------------------------------------------------------------------
def ref_forward(x, p):
    x = x.reshape(-1, 1, 10, 10).astype(jnp.float32)

    def conv(inp, w, b, pad):
        y = jax.lax.conv_general_dilated(
            inp, w, (1, 1), [(pad, pad), (pad, pad)],
            dimension_numbers=("NCHW", "OIHW", "NCHW"))
        return y + b[None, :, None, None]

    r = jax.nn.relu
    o0 = r(conv(x, p["w0"], p["b0"], 0))
    o1 = r(conv(x, p["w1"], p["b1"], 1))
    o2 = r(conv(x, p["w2"], p["b2"], 2))
    o3 = r(conv(x, p["w3"], p["b3"], 3))
    y = jnp.concatenate([o0, o1, o2, o3], axis=1)
    y = r(conv(y, p["wc1"], p["bc1"], 1))
    flat = y.reshape(y.shape[0], -1)
    h = r(flat @ p["wl1"].T + p["bl1"])
    h = r(h @ p["wfc1"].T + p["bfc1"])
    a = h @ p["wadv"].T + p["badv"]
    v = h @ p["wval"].T + p["bval"]
    return v + (a - jnp.mean(a, axis=-1, keepdims=True))


if __name__ == "__main__":
    key = jax.random.PRNGKey(0)
    kx, kp = jax.random.split(key)

    # batch=2, each state is a flattened 10x10 grid (reshaped inside forward)
    x = jax.random.normal(kx, (2, 100), jnp.float32)
    params = init_params(kp)
    packed = pack_params(params)          # one-time packing; no per-call transposes

    q = jax.jit(d3qn_forward)(x, packed)
    q = jax.block_until_ready(q)

    q_ref = ref_forward(x, params)
    assert q.shape == (2, 100), q.shape
    rel_err = float(jnp.max(jnp.abs(q - q_ref)) /
                    (jnp.max(jnp.abs(q_ref)) + 1e-6))
    if not (rel_err < 5e-2):
        raise AssertionError(f"Pallas result mismatch, rel_err={rel_err}")

    print("KERNEL_OK")
</pallas_src>

<mosaic_0001>
module attributes {stable_mosaic.version = 11 : i64} {
  func.func @_conv_stage_kernel(%arg0: memref<200x81xbf16, #tpu.memory_space<vmem>>, %arg1: memref<200x225xf32, #tpu.memory_space<vmem>>, %arg2: memref<81x225xbf16, #tpu.memory_space<vmem>>, %arg3: memref<1x225xf32, #tpu.memory_space<vmem>>, %arg4: memref<225x12xbf16, #tpu.memory_space<vmem>>, %arg5: memref<1x12xf32, #tpu.memory_space<vmem>>, %arg6: memref<200x12xf32, #tpu.memory_space<vmem>>) attributes {dimension_semantics = [], scalar_prefetch = 0 : i64, scratch_operands = 0 : i64, tpu.core_type = #tpu.core_type<tc>} {
    %c0 = arith.constant 0 : index
    %c0_0 = arith.constant 0 : index
    %0 = vector.load %arg0[%c0, %c0_0] : memref<200x81xbf16, #tpu.memory_space<vmem>>, vector<200x81xbf16>
    %c0_1 = arith.constant 0 : index
    %c0_2 = arith.constant 0 : index
    %1 = vector.load %arg2[%c0_1, %c0_2] : memref<81x225xbf16, #tpu.memory_space<vmem>>, vector<81x225xbf16>
    %cst = arith.constant dense<0.000000e+00> : vector<200x225xf32>
    %2 = tpu.matmul %0, %1, %cst {dimension_numbers = #tpu.dot_dimension_numbers<[1], [0], [0], [1], [0, 0, 1, 1], [], []>} : vector<200x81xbf16>, vector<81x225xbf16>, vector<200x225xf32> -> vector<200x225xf32>
    %c0_3 = arith.constant 0 : index
    %c0_4 = arith.constant 0 : index
    %3 = vector.load %arg3[%c0_3, %c0_4] : memref<1x225xf32, #tpu.memory_space<vmem>>, vector<1x225xf32>
    %4 = vector.broadcast %3 : vector<1x225xf32> to vector<200x225xf32>
    %5 = arith.addf %2, %4 : vector<200x225xf32>
    %cst_5 = arith.constant 0.000000e+00 : f32
    %6 = vector.broadcast %cst_5 : f32 to vector<200x225xf32>
    %7 = arith.maximumf %5, %6 : vector<200x225xf32>
    %c0_6 = arith.constant 0 : index
    %c0_7 = arith.constant 0 : index
    %8 = vector.load %arg1[%c0_6, %c0_7] : memref<200x225xf32, #tpu.memory_space<vmem>>, vector<200x225xf32>
    %9 = arith.mulf %7, %8 : vector<200x225xf32>
    %10 = arith.truncf %9 : vector<200x225xf32> to vector<200x225xbf16>
    %c0_8 = arith.constant 0 : index
    %c0_9 = arith.constant 0 : index
    %11 = vector.load %arg4[%c0_8, %c0_9] : memref<225x12xbf16, #tpu.memory_space<vmem>>, vector<225x12xbf16>
    %cst_10 = arith.constant dense<0.000000e+00> : vector<200x12xf32>
    %12 = tpu.matmul %10, %11, %cst_10 {dimension_numbers = #tpu.dot_dimension_numbers<[1], [0], [0], [1], [0, 0, 1, 1], [], []>} : vector<200x225xbf16>, vector<225x12xbf16>, vector<200x12xf32> -> vector<200x12xf32>
    %c0_11 = arith.constant 0 : index
    %c0_12 = arith.constant 0 : index
    %13 = vector.load %arg5[%c0_11, %c0_12] : memref<1x12xf32, #tpu.memory_space<vmem>>, vector<1x12xf32>
    %14 = vector.broadcast %13 : vector<1x12xf32> to vector<200x12xf32>
    %15 = arith.addf %12, %14 : vector<200x12xf32>
    %cst_13 = arith.constant 0.000000e+00 : f32
    %16 = vector.broadcast %cst_13 : f32 to vector<200x12xf32>
    %17 = arith.maximumf %15, %16 : vector<200x12xf32>
    %c0_14 = arith.constant 0 : index
    %c0_15 = arith.constant 0 : index
    %18 = vector.load %arg6[%c0_14, %c0_15] : memref<200x12xf32, #tpu.memory_space<vmem>>, vector<200x12xf32>
    tpu.vector_store %arg6[%c0_14, %c0_15], %17 {strides = array<i32>} : memref<200x12xf32, #tpu.memory_space<vmem>>, vector<200x12xf32>,
    return
  }
}

module attributes {stable_mosaic.version = 11 : i64} {
  func.func @_mlp_head_kernel(%arg0: memref<2x1200xf32, #tpu.memory_space<vmem>>, %arg1: memref<1200x200xbf16, #tpu.memory_space<vmem>>, %arg2: memref<1x200xf32, #tpu.memory_space<vmem>>, %arg3: memref<200x200xbf16, #tpu.memory_space<vmem>>, %arg4: memref<1x200xf32, #tpu.memory_space<vmem>>, %arg5: memref<200x128xbf16, #tpu.memory_space<vmem>>, %arg6: memref<1x128xf32, #tpu.memory_space<vmem>>, %arg7: memref<2x128xf32, #tpu.memory_space<vmem>>) attributes {dimension_semantics = [], scalar_prefetch = 0 : i64, scratch_operands = 0 : i64, tpu.core_type = #tpu.core_type<tc>} {
    %c0 = arith.constant 0 : index
    %c0_0 = arith.constant 0 : index
    %0 = vector.load %arg0[%c0, %c0_0] : memref<2x1200xf32, #tpu.memory_space<vmem>>, vector<2x1200xf32>
    %1 = arith.truncf %0 : vector<2x1200xf32> to vector<2x1200xbf16>
    %c0_1 = arith.constant 0 : index
    %c0_2 = arith.constant 0 : index
    %2 = vector.load %arg1[%c0_1, %c0_2] : memref<1200x200xbf16, #tpu.memory_space<vmem>>, vector<1200x200xbf16>
    %cst = arith.constant dense<0.000000e+00> : vector<2x200xf32>
    %3 = tpu.matmul %1, %2, %cst {dimension_numbers = #tpu.dot_dimension_numbers<[1], [0], [0], [1], [0, 0, 1, 1], [], []>} : vector<2x1200xbf16>, vector<1200x200xbf16>, vector<2x200xf32> -> vector<2x200xf32>
    %c0_3 = arith.constant 0 : index
    %c0_4 = arith.constant 0 : index
    %4 = vector.load %arg2[%c0_3, %c0_4] : memref<1x200xf32, #tpu.memory_space<vmem>>, vector<1x200xf32>
    %5 = vector.broadcast %4 : vector<1x200xf32> to vector<2x200xf32>
    %6 = arith.addf %3, %5 : vector<2x200xf32>
    %cst_5 = arith.constant 0.000000e+00 : f32
    %7 = vector.broadcast %cst_5 : f32 to vector<2x200xf32>
    %8 = arith.maximumf %6, %7 : vector<2x200xf32>
    %9 = arith.truncf %8 : vector<2x200xf32> to vector<2x200xbf16>
    %c0_6 = arith.constant 0 : index
    %c0_7 = arith.constant 0 : index
    %10 = vector.load %arg3[%c0_6, %c0_7] : memref<200x200xbf16, #tpu.memory_space<vmem>>, vector<200x200xbf16>
    %cst_8 = arith.constant dense<0.000000e+00> : vector<2x200xf32>
    %11 = tpu.matmul %9, %10, %cst_8 {dimension_numbers = #tpu.dot_dimension_numbers<[1], [0], [0], [1], [0, 0, 1, 1], [], []>} : vector<2x200xbf16>, vector<200x200xbf16>, vector<2x200xf32> -> vector<2x200xf32>
    %c0_9 = arith.constant 0 : index
    %c0_10 = arith.constant 0 : index
    %12 = vector.load %arg4[%c0_9, %c0_10] : memref<1x200xf32, #tpu.memory_space<vmem>>, vector<1x200xf32>
    %13 = vector.broadcast %12 : vector<1x200xf32> to vector<2x200xf32>
    %14 = arith.addf %11, %13 : vector<2x200xf32>
    %cst_11 = arith.constant 0.000000e+00 : f32
    %15 = vector.broadcast %cst_11 : f32 to vector<2x200xf32>
    %16 = arith.maximumf %14, %15 : vector<2x200xf32>
    %17 = arith.truncf %16 : vector<2x200xf32> to vector<2x200xbf16>
    %c0_12 = arith.constant 0 : index
    %c0_13 = arith.constant 0 : index
    %18 = vector.load %arg5[%c0_12, %c0_13] : memref<200x128xbf16, #tpu.memory_space<vmem>>, vector<200x128xbf16>
    %cst_14 = arith.constant dense<0.000000e+00> : vector<2x128xf32>
    %19 = tpu.matmul %17, %18, %cst_14 {dimension_numbers = #tpu.dot_dimension_numbers<[1], [0], [0], [1], [0, 0, 1, 1], [], []>} : vector<2x200xbf16>, vector<200x128xbf16>, vector<2x128xf32> -> vector<2x128xf32>
    %c0_15 = arith.constant 0 : index
    %c0_16 = arith.constant 0 : index
    %20 = vector.load %arg6[%c0_15, %c0_16] : memref<1x128xf32, #tpu.memory_space<vmem>>, vector<1x128xf32>
    %21 = vector.broadcast %20 : vector<1x128xf32> to vector<2x128xf32>
    %22 = arith.addf %19, %21 : vector<2x128xf32>
    %c0_17 = arith.constant 0 : index
    %c0_18 = arith.constant 0 : index
    %23 = vector.load %arg7[%c0_17, %c0_18] : memref<2x128xf32, #tpu.memory_space<vmem>>, vector<2x128xf32>
    tpu.vector_store %arg7[%c0_17, %c0_18], %22 {strides = array<i32>} : memref<2x128xf32, #tpu.memory_space<vmem>>, vector<2x128xf32>,
    return
  }
}

</mosaic_0001>

<bundles_post_ra>
// kernel: d3qn_forward.2
= control target key start
LH: loop header
LB: loop body
LE: loop exit
PB: predicated region body
PF: predicated region fallthrough
CT: control target
= control target key end

     0   :  { %v1076_v1 = vmov 0   ;;  %vm230_vm0 = vcmask 1040384   ;;  %vm190_vm1 = vcmask 662528   ;;  %v62_v46 = vlaneseq  ;;  %s1641_s2 = inlined_call_operand.vmem [shape: bf16[81,225], index: 2, kind: input, shape index: {}]   ;;  %s1642_s0 = inlined_call_operand.vmem [shape: bf16[200,81], index: 0, kind: input, shape index: {}]   ;;  %s1643_s4 = inlined_call_operand.vmem [shape: bf16[225,12], index: 4, kind: input, shape index: {}]   ;;  %s1644_s3 = inlined_call_operand.vmem [shape: f32[1,225], index: 3, kind: input, shape index: {}]   ;;  %s1645_s1 = inlined_call_operand.vmem [shape: f32[200,225], index: 1, kind: input, shape index: {}]   ;;  %s1646_s5 = inlined_call_operand.vmem [shape: f32[1,12], index: 5, kind: input, shape index: {}]   ;;  %s1647_s6 = inlined_call_operand.vmem [shape: f32[200,12], index: 6, kind: output, shape index: {}]  }
   0x1   :  { %v1031_v0 = vld [vmem:[%s1641_s2 + $0x4] ss:$8 sps:$4 sm:$0xff]   ;;  %271 = vmatprep.mubr.bf16.mxu0 %v1076_v1  ;;  %1000 = vmatprep.subr.bf16.mxu1 %v1076_v1  ;;  %v1033_v2 = vld [vmem:[%s1641_s2] ss:$8 sps:$4 sm:$0xff]   ;;  %v1034_v3 = vld [vmem:[%s1641_s2 + $0x14] ss:$8 sps:$4 sm:$0xff]  }
   0x2   :  { %239 = vmatprep.subr.bf16.mxu0 %v1031_v0  ;;  %v1036_v4 = vld [vmem:[%s1641_s2 + $0x10] ss:$8 sps:$4 sm:$0xff]   ;;  %v1037_v5 = vld [vmem:[%s1641_s2 + $0x24] ss:$8 sps:$4 sm:$0xff]   ;;  %v1039_v6 = vld [vmem:[%s1641_s2 + $0x20] ss:$8 sps:$4 sm:$0xff]  }
   0x3   :  { %240 = vmatpush1.bf16.msra.mxu0 %v1033_v2  ;;  %v1040_v7 = vld [vmem:[%s1641_s2 + $0x34] ss:$8 sps:$4 sm:$0xff]   ;;  %v1042_v9 = vld [vmem:[%s1641_s2 + $0x30] ss:$8 sps:$4 sm:$0xff]   ;;  %v1043_v10 = vld [vmem:[%s1641_s2 + $0x44] ss:$8 sps:$4 sm:$0xff]  }
   0x4   :  { %241 = vmatprep.subr.bf16.mxu0 %v1034_v3  ;;  %v59_v8 = vld [vmem:[%s1641_s2 + $0x50] sm:$0x11]  ;;  %v1145_v12 = vsel %vm230_vm0, 65535, %v1076_v1  ;;  %v1045_v13 = vld [vmem:[%s1641_s2 + $0x40] ss:$8 sps:$4 sm:$0xff]   ;;  %v1064_v22 = vld [vmem:[%s1643_s4 + $0x18] sm:$0xff]  }
   0x5   :  { %v957_v11 = vcombine.high %v59_v8, %v59_v8  ;;  %v956_v14 = vcombine.low %v59_v8, %v59_v8  ;;  %v1061_v17 = vld [vmem:[%s1643_s4] sm:$0xff]   ;;  %v1062_v19 = vld [vmem:[%s1643_s4 + $0x8] sm:$0xff]   ;;  %v1063_v20 = vld [vmem:[%s1643_s4 + $0x10] sm:$0xff]   ;;  %v63_v47 = vshrl.u32 %v62_v46, 7  ;;  %vm699_vm2 = vcmask 793600  }
   0x6   :  { %v1048_v18 = vld [vmem:[%s1642_s0] sm:$0xff]   ;;  %1015 = vmatpush1.bf16.msra.mxu1 %v1061_v17  ;;  %v1049_v21 = vld [vmem:[%s1642_s0 + $0x8] sm:$0xff]   ;;  %v1050_v24 = vld [vmem:[%s1642_s0 + $0x10] sm:$0xff]   ;;  %vm903_vm3 = vcmask 97280  }
   0x7   :  { %242 = vmatpush1.bf16.msra.mxu0 %v1036_v4  ;;  %v237_v15 = vand.u32 %v957_v11, %v1145_v12  ;;  %v234_v16 = vand.u32 %v956_v14, %v1145_v12  ;;  %1001 = vmatprep.subr.bf16.mxu1 %v1076_v1  ;;  %v1065_v23 = vld [vmem:[%s1643_s4 + $0x20] sm:$0xff]   ;;  %v1066_v25 = vld [vmem:[%s1643_s4 + $0x28] sm:$0xff]   ;;  %v1067_v26 = vld [vmem:[%s1643_s4 + $0x30] sm:$0xff]   ;;  %v64_v48 = vsub.s32 0, %v63_v47  ;;  %v68_v50 = vsub.s32 1, %v63_v47 }
   0x8   :  { %243 = vmatprep.subr.bf16.mxu0 %v1037_v5  ;;  %v1051_v27 = vld [vmem:[%s1642_s0 + $0x18] sm:$0xff]   ;;  %v1069_v29 = vld [vmem:[%s1643_s4 + $0x40] sm:$0xff]   ;;  %v1070_v31 = vld [vmem:[%s1643_s4 + $0x48] sm:$0xff]  }
   0x9   :  { %v1068_v28 = vld [vmem:[%s1643_s4 + $0x38] sm:$0xff]   ;;  %v1052_v30 = vld [vmem:[%s1642_s0 + $0x20] sm:$0xff]   ;;  %v1071_v32 = vld [vmem:[%s1643_s4 + $0x50] sm:$0xff]  }
   0xa   :  { %1016 = vmatpush1.bf16.msra.mxu1 %v1062_v19  ;;  %v1053_v33 = vld [vmem:[%s1642_s0 + $0x28] sm:$0xff]   ;;  %v1072_v34 = vld [vmem:[%s1643_s4 + $0x58] sm:$0xff]   ;;  %v1054_v35 = vld [vmem:[%s1642_s0 + $0x30] sm:$0xff]  }
   0xb   :  { %244 = vmatpush1.bf16.msra.mxu0 %v1039_v6  ;;  %1002 = vmatprep.subr.bf16.mxu1 %v1076_v1  ;;  %v1055_v36 = vld [vmem:[%s1642_s0 + $0x38] sm:$0xff]   ;;  %v1056_v37 = vld [vmem:[%s1642_s0 + $0x40] sm:$0xff]   ;;  %v1057_v38 = vld [vmem:[%s1642_s0 + $0x48] sm:$0xff]  }
   0xc   :  { %245 = vmatprep.subr.bf16.mxu0 %v1040_v7  ;;  %v1058_v39 = vld [vmem:[%s1642_s0 + $0x50] sm:$0xff]   ;;  %v1073_v40 = vld [vmem:[%s1643_s4 + $0x60] sm:$0xff]   ;;  %v1059_v41 = vld [vmem:[%s1642_s0 + $0x58] sm:$0xff]  }
   0xd   :  { %v1074_v42 = vld [vmem:[%s1643_s4 + $0x68] sm:$0xff]   ;;  %v1075_v43 = vld [vmem:[%s1643_s4 + $0x70] ss:$0 sps:$4 sm:$0x11]   ;;  %v1060_v45 = vld [vmem:[%s1642_s0 + $0x60] ss:$0 sps:$4 sm:$0xff]  }
   0xe   :  { %1017 = vmatpush1.bf16.msra.mxu1 %v1063_v20  ;;  %v740_v44 = vand.u32 %v1075_v43, %v1145_v12  ;;  %v60_v49 = vld [vmem:[%s1644_s3] sm:$0x3]  ;;  %v452_v63 = vld [vmem:[%s1645_s1 + $0x10] sm:$0xff]  ;;  %v453_v3 = vld [vmem:[%s1645_s1 + $0x18] sm:$0xff] }
   0xf   :  { %246 = vmatpush1.bf16.msra.mxu0 %v1042_v9  ;;  %1003 = vmatprep.subr.bf16.mxu1 %v1076_v1  ;;  %v1294_v51 = vrot.slane %v60_v49, %v64_v48  ;;  %v1296_v52 = vrot.slane %v60_v49, %v68_v50  ;;  %v450_v61 = vld [vmem:[%s1645_s1] sm:$0xff]  ;;  %v460_v43 = vld [vmem:[%s1645_s1 + $0x50] sm:$0xff]  ;;  %v461_v47 = vld [vmem:[%s1645_s1 + $0x58] sm:$0xff] }
  0x10   :  { %247 = vmatprep.subr.bf16.mxu0 %v1043_v10 }
  0x12   :  { %1018 = vmatpush1.bf16.msra.mxu1 %v1064_v22 }
  0x13   :  { %248 = vmatpush1.bf16.msra.mxu0 %v1045_v13  ;;  %1004 = vmatprep.subr.bf16.mxu1 %v1076_v1 }
  0x14   :  { %249 = vmatprep.subr.bf16.mxu0 %v237_v15 }
  0x16   :  { %1019 = vmatpush1.bf16.msra.mxu1 %v1065_v23 }
  0x17   :  { %250 = vmatpush1.bf16.msra.mxu0 %v234_v16  ;;  %1005 = vmatprep.subr.bf16.mxu1 %v1076_v1 }
  0x18   :  { %742 = vmatprep.subr.bf16.mxu0 %v1076_v1 }
  0x1a   :  { %958 = vmatmul.mubr.msk.bf16.vlgmr.msra.gmra.mrb[0].mxu0 %vm190_vm1, %v1048_v18  ;;  %1020 = vmatpush1.bf16.msra.mxu1 %v1066_v25 }
  0x1b   :  { %281 = vmatprep.mubr.bf16.mxu0 %v1076_v1  ;;  %743 = vmatpush1.bf16.msra.mxu0 %v1061_v17 }
  0x1c   :  { %744 = vmatprep.subr.bf16.mxu0 %v1076_v1  ;;  %1006 = vmatprep.subr.bf16.mxu1 %v1076_v1 }
  0x1e   :  { %1021 = vmatpush1.bf16.msra.mxu1 %v1067_v26 }
  0x1f   :  { %745 = vmatpush1.bf16.msra.mxu0 %v1062_v19  ;;  %1007 = vmatprep.subr.bf16.mxu1 %v1076_v1  ;;  %v454_v19 = vld [vmem:[%s1645_s1 + $0x20] sm:$0xff] }
  0x20   :  { %746 = vmatprep.subr.bf16.mxu0 %v1076_v1 }
  0x22   :  { %959 = vmatmul.mubr.msk.bf16.gmra.mrb[4].mxu0 %vm190_vm1, %v1049_v21  ;;  %1022 = vmatpush1.bf16.msra.mxu1 %v1068_v28  ;;  %v456_v21 = vld [vmem:[%s1645_s1 + $0x30] sm:$0xff] }
  0x23   :  { %291 = vmatprep.mubr.bf16.mxu0 %v1076_v1  ;;  %747 = vmatpush1.bf16.msra.mxu0 %v1063_v20 }
  0x24   :  { %748 = vmatprep.subr.bf16.mxu0 %v1076_v1  ;;  %1008 = vmatprep.subr.bf16.mxu1 %v1076_v1 }
  0x26   :  { %1023 = vmatpush1.bf16.msra.mxu1 %v1069_v29 }
  0x27   :  { %749 = vmatpush1.bf16.msra.mxu0 %v1064_v22  ;;  %1009 = vmatprep.subr.bf16.mxu1 %v1076_v1 }
  0x28   :  { %750 = vmatprep.subr.bf16.mxu0 %v1076_v1 }
  0x2a   :  { %960 = vmatmul.mubr.msk.bf16.gmra.mrb[8].mxu0 %vm190_vm1, %v1050_v24  ;;  %1024 = vmatpush1.bf16.msra.mxu1 %v1070_v31 }
  0x2b   :  { %301 = vmatprep.mubr.bf16.mxu0 %v1076_v1  ;;  %751 = vmatpush1.bf16.msra.mxu0 %v1065_v23  ;;  %v455_v23 = vld [vmem:[%s1645_s1 + $0x28] sm:$0xff] }
  0x2c   :  { %752 = vmatprep.subr.bf16.mxu0 %v1076_v1  ;;  %1010 = vmatprep.subr.bf16.mxu1 %v1076_v1 }
  0x2e   :  { %1025 = vmatpush1.bf16.msra.mxu1 %v1071_v32 }
  0x2f   :  { %753 = vmatpush1.bf16.msra.mxu0 %v1066_v25  ;;  %1011 = vmatprep.subr.bf16.mxu1 %v1076_v1  ;;  %v457_v25 = vld [vmem:[%s1645_s1 + $0x38] sm:$0xff] }
  0x30   :  { %754 = vmatprep.subr.bf16.mxu0 %v1076_v1 }
  0x32   :  { %961 = vmatmul.mubr.msk.bf16.gmra.mrb[12].mxu0 %vm190_vm1, %v1051_v27  ;;  %1026 = vmatpush1.bf16.msra.mxu1 %v1072_v34 }
  0x33   :  { %311 = vmatprep.mubr.bf16.mxu0 %v1076_v1  ;;  %755 = vmatpush1.bf16.msra.mxu0 %v1067_v26 }
  0x34   :  { %756 = vmatprep.subr.bf16.mxu0 %v1076_v1  ;;  %1012 = vmatprep.subr.bf16.mxu1 %v1076_v1 }
  0x36   :  { %1027 = vmatpush1.bf16.msra.mxu1 %v1073_v40 }
  0x37   :  { %757 = vmatpush1.bf16.msra.mxu0 %v1068_v28  ;;  %1013 = vmatprep.subr.bf16.mxu1 %v1076_v1 }
  0x38   :  { %758 = vmatprep.subr.bf16.mxu0 %v1076_v1 }
  0x3a   :  { %962 = vmatmul.mubr.msk.bf16.gmra.mrb[16].mxu0 %vm190_vm1, %v1052_v30  ;;  %1028 = vmatpush1.bf16.msra.mxu1 %v1074_v42 }
  0x3b   :  { %321 = vmatprep.mubr.bf16.mxu0 %v1076_v1  ;;  %759 = vmatpush1.bf16.msra.mxu0 %v1069_v29 }
  0x3c   :  { %760 = vmatprep.subr.bf16.mxu0 %v1076_v1  ;;  %1014 = vmatprep.subr.bf16.mxu1 %v1076_v1 }
  0x3e   :  { %1029 = vmatpush1.bf16.msra.mxu1 %v740_v44 }
  0x3f   :  { %761 = vmatpush1.bf16.msra.mxu0 %v1070_v31 }
  0x40   :  { %762 = vmatprep.subr.bf16.mxu0 %v1076_v1 }
  0x42   :  { %963 = vmatmul.mubr.msk.bf16.gmra.mrb[20].mxu0 %vm190_vm1, %v1053_v33 }
  0x43   :  { %331 = vmatprep.mubr.bf16.mxu0 %v1076_v1  ;;  %763 = vmatpush1.bf16.msra.mxu0 %v1071_v32 }
  0x44   :  { %764 = vmatprep.subr.bf16.mxu0 %v1076_v1 }
  0x47   :  { %765 = vmatpush1.bf16.msra.mxu0 %v1072_v34 }
  0x48   :  { %766 = vmatprep.subr.bf16.mxu0 %v1076_v1 }
  0x4a   :  { %964 = vmatmul.mubr.msk.bf16.gmra.mrb[24].mxu0 %vm190_vm1, %v1054_v35 }
  0x4b   :  { %341 = vmatprep.mubr.bf16.mxu0 %v1076_v1  ;;  %767 = vmatpush1.bf16.msra.mxu0 %v1073_v40 }
  0x4c   :  { %768 = vmatprep.subr.bf16.mxu0 %v1076_v1 }
  0x4f   :  { %769 = vmatpush1.bf16.msra.mxu0 %v1074_v42 }
  0x50   :  { %770 = vmatprep.subr.bf16.mxu0 %v1076_v1 }
  0x52   :  { %965 = vmatmul.mubr.msk.bf16.gmra.mrb[28].mxu0 %vm190_vm1, %v1055_v36 }
  0x53   :  { %351 = vmatprep.mubr.bf16.mxu0 %v1076_v1  ;;  %771 = vmatpush1.bf16.msra.mxu0 %v740_v44 }
  0x5a   :  { %966 = vmatmul.mubr.msk.bf16.gmra.mrb[32].mxu0 %vm190_vm1, %v1056_v37 }
  0x5b   :  { %361 = vmatprep.mubr.bf16.mxu0 %v1076_v1 }
  0x62   :  { %967 = vmatmul.mubr.msk.bf16.gmra.mrb[36].mxu0 %vm190_vm1, %v1057_v38 }
  0x63   :  { %371 = vmatprep.mubr.bf16.mxu0 %v1076_v1 }
  0x6a   :  { %968 = vmatmul.mubr.msk.bf16.gmra.mrb[40].mxu0 %vm190_vm1, %v1058_v39 }
  0x6b   :  { %381 = vmatprep.mubr.bf16.mxu0 %v1076_v1 }
  0x72   :  { %969 = vmatmul.mubr.msk.bf16.gmra.mrb[44].mxu0 %vm190_vm1, %v1059_v41  ;;  %v458_v41 = vld [vmem:[%s1645_s1 + $0x40] sm:$0xff] }
  0x73   :  { %391 = vmatprep.mubr.bf16.mxu0 %v1076_v1  ;;  %v451_v1 = vld [vmem:[%s1645_s1 + $0x8] sm:$0xff] }
  0x7a   :  { %970 = vmatmul.mubr.msk.bf16.gmra.mrb[48].mxu0 %vm190_vm1, %v1060_v45  ;;  %v459_v45 = vld [vmem:[%s1645_s1 + $0x48] sm:$0xff] }
  0xed   :  { %v273_v53 = vpop.f32.mrb[0].mxu0 }
  0xee   :  { %v274_v54 = vadd.f32 %v273_v53, %v1294_v51  ;;  %v275_v55 = vpop.f32.mrb[1].mxu0 }
  0xef   :  { %v276_v56 = vadd.f32 %v275_v55, %v1296_v52  ;;  %v277_v57 = vpop.f32.mrb[2].mxu0 }
  0xf0   :  { %v400_v58 = vmax.f32 %v274_v54, 0.0  ;;  %v278_v59 = vadd.f32 %v277_v57, %v1294_v51  ;;  %v279_v60 = vpop.f32.mrb[3].mxu0 }
  0xf1   :  { %v401_v62 = vmax.f32 %v276_v56, 0.0  ;;  %v280_v0 = vadd.f32 %v279_v60, %v1296_v52 }
  0xf2   :  { %v402_v2 = vmax.f32 %v278_v59, 0.0  ;;  %v500_v5 = vmul.f32 %v450_v61, %v400_v58 }
  0xf3   :  { %v403_v4 = vmax.f32 %v280_v0, 0.0  ;;  %v501_v7 = vmul.f32 %v451_v1, %v401_v62  ;;  %v462_v1 = vld [vmem:[%s1645_s1 + $0x60] sm:$0xff] }
  0xf4   :  { %v502_v6 = vmul.f32 %v452_v63, %v402_v2 }
  0xf5   :  { %v503_v8 = vmul.f32 %v453_v3, %v403_v4  ;;  %v283_v9 = vpop.f32.mrb[4].mxu0  ;;  %v464_v3 = vld [vmem:[%s1645_s1 + $0x70] sm:$0xff] }
  0xf6   :  { %v550_v10 = vpack.c.bf16 %v502_v6, %v500_v5  ;;  %v284_v11 = vadd.f32 %v283_v9, %v1294_v51  ;;  %v285_v12 = vpop.f32.mrb[5].mxu0  ;;  %v463_v5 = vld [vmem:[%s1645_s1 + $0x68] sm:$0xff] }
  0xf7   :  { %v551_v13 = vpack.c.bf16 %v503_v8, %v501_v7  ;;  %v286_v14 = vadd.f32 %v285_v12, %v1296_v52  ;;  %v287_v15 = vpop.f32.mrb[6].mxu0  ;;  %v465_v7 = vld [vmem:[%s1645_s1 + $0x78] sm:$0xff] }
  0xf8   :  { %v404_v16 = vmax.f32 %v284_v11, 0.0  ;;  %v288_v17 = vadd.f32 %v287_v15, %v1294_v51  ;;  %v289_v18 = vpop.f32.mrb[7].mxu0 }
  0xf9   :  { %v405_v20 = vmax.f32 %v286_v14, 0.0  ;;  %v290_v22 = vadd.f32 %v289_v18, %v1296_v52  ;;  %987 = vmatprep.mubr.msk.bf16.mxu0 %vm699_vm2, %v551_v13 }
  0xfa   :  { %v406_v24 = vmax.f32 %v288_v17, 0.0  ;;  %775 = vmatmul.mubr.bf16.vlgmr.msra.gmra.mrb[52].mxu0 %v550_v10  ;;  %v504_v27 = vmul.f32 %v454_v19, %v404_v16 }
  0xfb   :  { %v407_v26 = vmax.f32 %v290_v22, 0.0  ;;  %v505_v29 = vmul.f32 %v455_v23, %v405_v20  ;;  %v466_v23 = vld [vmem:[%s1645_s1 + $0x80] sm:$0xff] }
  0xfc   :  { %v506_v28 = vmul.f32 %v456_v21, %v406_v24 }
  0xfd   :  { %v507_v30 = vmul.f32 %v457_v25, %v407_v26  ;;  %v293_v31 = vpop.f32.mrb[8].mxu0  ;;  %v468_v25 = vld [vmem:[%s1645_s1 + $0x90] sm:$0xff] }
  0xfe   :  { %v294_v32 = vadd.f32 %v293_v31, %v1294_v51  ;;  %v295_v33 = vpop.f32.mrb[9].mxu0  ;;  %v552_v34 = vpack.c.bf16 %v506_v28, %v504_v27  ;;  %v467_v27 = vld [vmem:[%s1645_s1 + $0x88] sm:$0xff] }
  0xff   :  { %v553_v35 = vpack.c.bf16 %v507_v30, %v505_v29  ;;  %v296_v36 = vadd.f32 %v295_v33, %v1296_v52  ;;  %v297_v37 = vpop.f32.mrb[10].mxu0  ;;  %v469_v29 = vld [vmem:[%s1645_s1 + $0x98] sm:$0xff] }
 0x100   :  { %v408_v38 = vmax.f32 %v294_v32, 0.0  ;;  %v298_v39 = vadd.f32 %v297_v37, %v1294_v51  ;;  %v299_v40 = vpop.f32.mrb[11].mxu0 }
 0x101   :  { %v409_v42 = vmax.f32 %v296_v36, 0.0  ;;  %v300_v44 = vadd.f32 %v299_v40, %v1296_v52  ;;  %988 = vmatprep.mubr.msk.bf16.mxu0 %vm699_vm2, %v553_v35 }
 0x102   :  { %v410_v46 = vmax.f32 %v298_v39, 0.0  ;;  %783 = vmatmul.mubr.bf16.gmra.mrb[56].mxu0 %v552_v34  ;;  %v508_v49 = vmul.f32 %v458_v41, %v408_v38 }
 0x103   :  { %v411_v48 = vmax.f32 %v300_v44, 0.0  ;;  %v509_v53 = vmul.f32 %v459_v45, %v409_v42  ;;  %v470_v45 = vld [vmem:[%s1645_s1 + $0xa0] sm:$0xff] }
 0x104   :  { %v510_v50 = vmul.f32 %v460_v43, %v410_v46 }
 0x105   :  { %v511_v54 = vmul.f32 %v461_v47, %v411_v48  ;;  %v303_v55 = vpop.f32.mrb[12].mxu0  ;;  %v472_v47 = vld [vmem:[%s1645_s1 + $0xb0] sm:$0xff] }
 0x106   :  { %v304_v56 = vadd.f32 %v303_v55, %v1294_v51  ;;  %v305_v57 = vpop.f32.mrb[13].mxu0  ;;  %v554_v58 = vpack.c.bf16 %v510_v50, %v508_v49  ;;  %v471_v49 = vld [vmem:[%s1645_s1 + $0xa8] sm:$0xff] }
 0x107   :  { %v306_v59 = vadd.f32 %v305_v57, %v1296_v52  ;;  %v307_v60 = vpop.f32.mrb[14].mxu0  ;;  %v555_v61 = vpack.c.bf16 %v511_v54, %v509_v53  ;;  %v473_v53 = vld [vmem:[%s1645_s1 + $0xb8] sm:$0xff] }
 0x108   :  { %v412_v62 = vmax.f32 %v304_v56, 0.0  ;;  %v308_v63 = vadd.f32 %v307_v60, %v1294_v51  ;;  %v309_v0 = vpop.f32.mrb[15].mxu0 }
 0x109   :  { %v413_v2 = vmax.f32 %v306_v59, 0.0  ;;  %v310_v4 = vadd.f32 %v309_v0, %v1296_v52  ;;  %989 = vmatprep.mubr.msk.bf16.mxu1 %vm699_vm2, %v555_v61 }
 0x10a   :  { %v414_v6 = vmax.f32 %v308_v63, 0.0  ;;  %791 = vmatmul.mubr.bf16.vlgmr.msra.gmra.mrb[0].mxu1 %v554_v58  ;;  %v512_v9 = vmul.f32 %v462_v1, %v412_v62 }
 0x10b   :  { %v415_v8 = vmax.f32 %v310_v4, 0.0  ;;  %v513_v11 = vmul.f32 %v463_v5, %v413_v2  ;;  %v474_v5 = vld [vmem:[%s1645_s1 + $0xc0] sm:$0xff] }
 0x10c   :  { %v514_v10 = vmul.f32 %v464_v3, %v414_v6 }
 0x10d   :  { %v515_v12 = vmul.f32 %v465_v7, %v415_v8  ;;  %v313_v13 = vpop.f32.mrb[16].mxu0  ;;  %v476_v7 = vld [vmem:[%s1645_s1 + $0xd0] sm:$0xff] }
 0x10e   :  { %v314_v14 = vadd.f32 %v313_v13, %v1294_v51  ;;  %v315_v15 = vpop.f32.mrb[17].mxu0  ;;  %v556_v16 = vpack.c.bf16 %v514_v10, %v512_v9  ;;  %v475_v9 = vld [vmem:[%s1645_s1 + $0xc8] sm:$0xff] }
 0x10f   :  { %v557_v17 = vpack.c.bf16 %v515_v12, %v513_v11  ;;  %v316_v18 = vadd.f32 %v315_v15, %v1296_v52  ;;  %v317_v19 = vpop.f32.mrb[18].mxu0  ;;  %v477_v11 = vld [vmem:[%s1645_s1 + $0xd8] sm:$0xff] }
 0x110   :  { %v416_v20 = vmax.f32 %v314_v14, 0.0  ;;  %v318_v21 = vadd.f32 %v317_v19, %v1294_v51  ;;  %v319_v22 = vpop.f32.mrb[19].mxu0 }
 0x111   :  { %v417_v24 = vmax.f32 %v316_v18, 0.0  ;;  %v320_v26 = vadd.f32 %v319_v22, %v1296_v52  ;;  %990 = vmatprep.mubr.msk.bf16.mxu1 %vm699_vm2, %v557_v17 }
 0x112   :  { %v418_v28 = vmax.f32 %v318_v21, 0.0  ;;  %799 = vmatmul.mubr.bf16.gmra.mrb[4].mxu1 %v556_v16  ;;  %v516_v31 = vmul.f32 %v466_v23, %v416_v20 }
 0x113   :  { %v419_v30 = vmax.f32 %v320_v26, 0.0  ;;  %v517_v33 = vmul.f32 %v467_v27, %v417_v24  ;;  %v478_v27 = vld [vmem:[%s1645_s1 + $0xe0] sm:$0xff] }
 0x114   :  { %v518_v32 = vmul.f32 %v468_v25, %v418_v28 }
 0x115   :  { %v519_v34 = vmul.f32 %v469_v29, %v419_v30  ;;  %v323_v35 = vpop.f32.mrb[20].mxu0  ;;  %v480_v29 = vld [vmem:[%s1645_s1 + $0xf0] sm:$0xff] }
 0x116   :  { %v324_v36 = vadd.f32 %v323_v35, %v1294_v51  ;;  %v325_v37 = vpop.f32.mrb[21].mxu0  ;;  %v558_v38 = vpack.c.bf16 %v518_v32, %v516_v31  ;;  %v479_v31 = vld [vmem:[%s1645_s1 + $0xe8] sm:$0xff] }
 0x117   :  { %v559_v39 = vpack.c.bf16 %v519_v34, %v517_v33  ;;  %v326_v40 = vadd.f32 %v325_v37, %v1296_v52  ;;  %v327_v41 = vpop.f32.mrb[22].mxu0  ;;  %v481_v33 = vld [vmem:[%s1645_s1 + $0xf8] sm:$0xff] }
 0x118   :  { %v420_v42 = vmax.f32 %v324_v36, 0.0  ;;  %v328_v43 = vadd.f32 %v327_v41, %v1294_v51  ;;  %v329_v44 = vpop.f32.mrb[23].mxu0 }
 0x119   :  { %v421_v46 = vmax.f32 %v326_v40, 0.0  ;;  %v330_v48 = vadd.f32 %v329_v44, %v1296_v52  ;;  %991 = vmatprep.mubr.msk.bf16.mxu1 %vm699_vm2, %v559_v39 }
 0x11a   :  { %v422_v50 = vmax.f32 %v328_v43, 0.0  ;;  %807 = vmatmul.mubr.bf16.gmra.mrb[8].mxu1 %v558_v38  ;;  %v520_v55 = vmul.f32 %v470_v45, %v420_v42 }
 0x11b   :  { %v423_v54 = vmax.f32 %v330_v48, 0.0  ;;  %v521_v57 = vmul.f32 %v471_v49, %v421_v46  ;;  %v482_v49 = vld [vmem:[%s1645_s1 + $0x100] sm:$0xff] }
 0x11c   :  { %v522_v56 = vmul.f32 %v472_v47, %v422_v50 }
 0x11d   :  { %v523_v58 = vmul.f32 %v473_v53, %v423_v54  ;;  %v333_v59 = vpop.f32.mrb[24].mxu0  ;;  %v484_v53 = vld [vmem:[%s1645_s1 + $0x110] sm:$0xff] }
 0x11e   :  { %v334_v60 = vadd.f32 %v333_v59, %v1294_v51  ;;  %v335_v61 = vpop.f32.mrb[25].mxu0  ;;  %v560_v62 = vpack.c.bf16 %v522_v56, %v520_v55  ;;  %v483_v55 = vld [vmem:[%s1645_s1 + $0x108] sm:$0xff] }
 0x11f   :  { %v561_v63 = vpack.c.bf16 %v523_v58, %v521_v57  ;;  %v336_v0 = vadd.f32 %v335_v61, %v1296_v52  ;;  %v337_v1 = vpop.f32.mrb[26].mxu0  ;;  %v485_v57 = vld [vmem:[%s1645_s1 + $0x118] sm:$0xff] }
 0x120   :  { %v424_v2 = vmax.f32 %v334_v60, 0.0  ;;  %v338_v3 = vadd.f32 %v337_v1, %v1294_v51  ;;  %v339_v4 = vpop.f32.mrb[27].mxu0 }
 0x121   :  { %v425_v6 = vmax.f32 %v336_v0, 0.0  ;;  %v340_v8 = vadd.f32 %v339_v4, %v1296_v52  ;;  %992 = vmatprep.mubr.msk.bf16.mxu1 %vm699_vm2, %v561_v63 }
 0x122   :  { %v426_v10 = vmax.f32 %v338_v3, 0.0  ;;  %815 = vmatmul.mubr.bf16.gmra.mrb[12].mxu1 %v560_v62  ;;  %v524_v13 = vmul.f32 %v474_v5, %v424_v2 }
 0x123   :  { %v427_v12 = vmax.f32 %v340_v8, 0.0  ;;  %v525_v15 = vmul.f32 %v475_v9, %v425_v6  ;;  %v486_v9 = vld [vmem:[%s1645_s1 + $0x120] sm:$0xff] }
 0x124   :  { %v526_v14 = vmul.f32 %v476_v7, %v426_v10 }
 0x125   :  { %v527_v16 = vmul.f32 %v477_v11, %v427_v12  ;;  %v343_v17 = vpop.f32.mrb[28].mxu0  ;;  %v488_v11 = vld [vmem:[%s1645_s1 + $0x130] sm:$0xff] }
 0x126   :  { %v344_v18 = vadd.f32 %v343_v17, %v1294_v51  ;;  %v345_v19 = vpop.f32.mrb[29].mxu0  ;;  %v562_v20 = vpack.c.bf16 %v526_v14, %v524_v13  ;;  %v487_v13 = vld [vmem:[%s1645_s1 + $0x128] sm:$0xff] }
 0x127   :  { %v563_v21 = vpack.c.bf16 %v527_v16, %v525_v15  ;;  %v346_v22 = vadd.f32 %v345_v19, %v1296_v52  ;;  %v347_v23 = vpop.f32.mrb[30].mxu0  ;;  %v489_v15 = vld [vmem:[%s1645_s1 + $0x138] sm:$0xff] }
 0x128   :  { %v428_v24 = vmax.f32 %v344_v18, 0.0  ;;  %v348_v25 = vadd.f32 %v347_v23, %v1294_v51  ;;  %v349_v26 = vpop.f32.mrb[31].mxu0 }
 0x129   :  { %v429_v28 = vmax.f32 %v346_v22, 0.0  ;;  %v350_v30 = vadd.f32 %v349_v26, %v1296_v52  ;;  %993 = vmatprep.mubr.msk.bf16.mxu1 %vm699_vm2, %v563_v21 }
 0x12a   :  { %v430_v32 = vmax.f32 %v348_v25, 0.0  ;;  %823 = vmatmul.mubr.bf16.gmra.mrb[16].mxu1 %v562_v20  ;;  %v528_v35 = vmul.f32 %v478_v27, %v428_v24 }
 0x12b   :  { %v431_v34 = vmax.f32 %v350_v30, 0.0  ;;  %v529_v37 = vmul.f32 %v479_v31, %v429_v28  ;;  %v490_v31 = vld [vmem:[%s1645_s1 + $0x140] sm:$0xff] }
 0x12c   :  { %v530_v36 = vmul.f32 %v480_v29, %v430_v32 }
 0x12d   :  { %v531_v38 = vmul.f32 %v481_v33, %v431_v34  ;;  %v353_v39 = vpop.f32.mrb[32].mxu0  ;;  %v492_v33 = vld [vmem:[%s1645_s1 + $0x150] sm:$0xff] }
 0x12e   :  { %v354_v40 = vadd.f32 %v353_v39, %v1294_v51  ;;  %v355_v41 = vpop.f32.mrb[33].mxu0  ;;  %v564_v42 = vpack.c.bf16 %v530_v36, %v528_v35  ;;  %v491_v35 = vld [vmem:[%s1645_s1 + $0x148] sm:$0xff] }
 0x12f   :  { %v565_v43 = vpack.c.bf16 %v531_v38, %v529_v37  ;;  %v356_v44 = vadd.f32 %v355_v41, %v1296_v52  ;;  %v357_v45 = vpop.f32.mrb[34].mxu0  ;;  %v493_v37 = vld [vmem:[%s1645_s1 + $0x158] sm:$0xff] }
 0x130   :  { %v432_v46 = vmax.f32 %v354_v40, 0.0  ;;  %v358_v47 = vadd.f32 %v357_v45, %v1294_v51  ;;  %v359_v48 = vpop.f32.mrb[35].mxu0 }
 0x131   :  { %v433_v50 = vmax.f32 %v356_v44, 0.0  ;;  %v360_v54 = vadd.f32 %v359_v48, %v1296_v52  ;;  %994 = vmatprep.mubr.msk.bf16.mxu1 %vm699_vm2, %v565_v43 }
 0x132   :  { %v434_v56 = vmax.f32 %v358_v47, 0.0  ;;  %831 = vmatmul.mubr.bf16.gmra.mrb[20].mxu1 %v564_v42  ;;  %v532_v59 = vmul.f32 %v482_v49, %v432_v46 }
 0x133   :  { %v435_v58 = vmax.f32 %v360_v54, 0.0  ;;  %v533_v61 = vmul.f32 %v483_v55, %v433_v50  ;;  %v494_v55 = vld [vmem:[%s1645_s1 + $0x160] sm:$0xff] }
 0x134   :  { %v534_v60 = vmul.f32 %v484_v53, %v434_v56 }
 0x135   :  { %v535_v62 = vmul.f32 %v485_v57, %v435_v58  ;;  %v363_v63 = vpop.f32.mrb[36].mxu0  ;;  %v496_v57 = vld [vmem:[%s1645_s1 + $0x170] sm:$0xff] }
 0x136   :  { %v364_v0 = vadd.f32 %v363_v63, %v1294_v51  ;;  %v365_v1 = vpop.f32.mrb[37].mxu0  ;;  %v566_v2 = vpack.c.bf16 %v534_v60, %v532_v59  ;;  %v495_v59 = vld [vmem:[%s1645_s1 + $0x168] sm:$0xff] }
 0x137   :  { %v567_v3 = vpack.c.bf16 %v535_v62, %v533_v61  ;;  %v366_v4 = vadd.f32 %v365_v1, %v1296_v52  ;;  %v367_v5 = vpop.f32.mrb[38].mxu0  ;;  %v497_v61 = vld [vmem:[%s1645_s1 + $0x178] sm:$0xff] }
 0x138   :  { %v436_v6 = vmax.f32 %v364_v0, 0.0  ;;  %v368_v7 = vadd.f32 %v367_v5, %v1294_v51  ;;  %v369_v8 = vpop.f32.mrb[39].mxu0 }
 0x139   :  { %v437_v10 = vmax.f32 %v366_v4, 0.0  ;;  %v370_v12 = vadd.f32 %v369_v8, %v1296_v52  ;;  %995 = vmatprep.mubr.msk.bf16.mxu1 %vm699_vm2, %v567_v3 }
 0x13a   :  { %v438_v14 = vmax.f32 %v368_v7, 0.0  ;;  %839 = vmatmul.mubr.bf16.gmra.mrb[24].mxu1 %v566_v2  ;;  %v536_v17 = vmul.f32 %v486_v9, %v436_v6 }
 0x13b   :  { %v439_v16 = vmax.f32 %v370_v12, 0.0  ;;  %v537_v19 = vmul.f32 %v487_v13, %v437_v10  ;;  %v498_v13 = vld [vmem:[%s1645_s1 + $0x180] sm:$0xff] }
 0x13c   :  { %v538_v18 = vmul.f32 %v488_v11, %v438_v14  ;;  %v499_v11 = vld [vmem:[%s1645_s1 + $0x188] sm:$0xff] }
 0x13d   :  { %v539_v20 = vmul.f32 %v489_v15, %v439_v16  ;;  %v373_v21 = vpop.f32.mrb[40].mxu0 }
 0x13e   :  { %v374_v22 = vadd.f32 %v373_v21, %v1294_v51  ;;  %v375_v23 = vpop.f32.mrb[41].mxu0  ;;  %v568_v24 = vpack.c.bf16 %v538_v18, %v536_v17  ;;  %v1514_v17 = vld [vmem:[%s1646_s5] ss:$0 sm:$0xff] }
 0x13f   :  { %v569_v25 = vpack.c.bf16 %v539_v20, %v537_v19  ;;  %v376_v26 = vadd.f32 %v375_v23, %v1296_v52  ;;  %v377_v27 = vpop.f32.mrb[42].mxu0 }
 0x140   :  { %v440_v28 = vmax.f32 %v374_v22, 0.0  ;;  %v378_v29 = vadd.f32 %v377_v27, %v1294_v51  ;;  %v379_v30 = vpop.f32.mrb[43].mxu0 }
 0x141   :  { %v441_v32 = vmax.f32 %v376_v26, 0.0  ;;  %v380_v34 = vadd.f32 %v379_v30, %v1296_v52  ;;  %996 = vmatprep.mubr.msk.bf16.mxu1 %vm699_vm2, %v569_v25 }
 0x142   :  { %v442_v36 = vmax.f32 %v378_v29, 0.0  ;;  %847 = vmatmul.mubr.bf16.gmra.mrb[28].mxu1 %v568_v24  ;;  %v540_v39 = vmul.f32 %v490_v31, %v440_v28 }
 0x143   :  { %v443_v38 = vmax.f32 %v380_v34, 0.0  ;;  %v541_v41 = vmul.f32 %v491_v35, %v441_v32 }
 0x144   :  { %v542_v40 = vmul.f32 %v492_v33, %v442_v36 }
 0x145   :  { %v543_v42 = vmul.f32 %v493_v37, %v443_v38  ;;  %v383_v43 = vpop.f32.mrb[44].mxu0 }
 0x146   :  { %v384_v44 = vadd.f32 %v383_v43, %v1294_v51  ;;  %v385_v45 = vpop.f32.mrb[45].mxu0  ;;  %v570_v46 = vpack.c.bf16 %v542_v40, %v540_v39 }
 0x147   :  { %v571_v47 = vpack.c.bf16 %v543_v42, %v541_v41  ;;  %v386_v48 = vadd.f32 %v385_v45, %v1296_v52  ;;  %v387_v49 = vpop.f32.mrb[46].mxu0 }
 0x148   :  { %v444_v50 = vmax.f32 %v384_v44, 0.0  ;;  %v388_v53 = vadd.f32 %v387_v49, %v1294_v51  ;;  %v389_v54 = vpop.f32.mrb[47].mxu0 }
 0x149   :  { %v445_v56 = vmax.f32 %v386_v48, 0.0  ;;  %v390_v58 = vadd.f32 %v389_v54, %v1296_v52  ;;  %997 = vmatprep.mubr.msk.bf16.mxu1 %vm699_vm2, %v571_v47 }
 0x14a   :  { %v446_v60 = vmax.f32 %v388_v53, 0.0  ;;  %855 = vmatmul.mubr.bf16.gmra.mrb[32].mxu1 %v570_v46  ;;  %v544_v63 = vmul.f32 %v494_v55, %v444_v50 }
 0x14b   :  { %v447_v62 = vmax.f32 %v390_v58, 0.0  ;;  %v545_v1 = vmul.f32 %v495_v59, %v445_v56 }
 0x14c   :  { %v546_v0 = vmul.f32 %v496_v57, %v446_v60 }
 0x14d   :  { %v547_v2 = vmul.f32 %v497_v61, %v447_v62  ;;  %v393_v3 = vpop.f32.mrb[48].mxu0 }
 0x14e   :  { %v394_v4 = vadd.f32 %v393_v3, %v1294_v51  ;;  %v395_v5 = vpop.f32.mrb[49].mxu0  ;;  %v572_v6 = vpack.c.bf16 %v546_v0, %v544_v63 }
 0x14f   :  { %v573_v7 = vpack.c.bf16 %v547_v2, %v545_v1  ;;  %v396_v8 = vadd.f32 %v395_v5, %v1296_v52  ;;  %v397_v9 = vpop.f32.mrb[50].mxu0 }
 0x150   :  { %v448_v10 = vmax.f32 %v394_v4, 0.0  ;;  %v398_v12 = vpop.f32.mrb[51].mxu0 }
 0x151   :  { %v449_v14 = vmax.f32 %v396_v8, 0.0  ;;  %998 = vmatprep.mubr.msk.bf16.mxu1 %vm699_vm2, %v573_v7 }
 0x152   :  { %863 = vmatmul.mubr.bf16.gmra.mrb[36].mxu1 %v572_v6  ;;  %v548_v15 = vmul.f32 %v498_v13, %v448_v10 }
 0x153   :  { %v549_v51 = vmul.f32 %v499_v11, %v449_v14 }
 0x154   :  { %v574_v52 = vpack.c.bf16 %v548_v15, %v548_v15 }
 0x155   :  { %v575_v16 = vpack.c.bf16 %v549_v51, %v549_v51 }
 0x157   :  { %999 = vmatprep.mubr.msk.bf16.mxu1 %vm699_vm2, %v575_v16 }
 0x15a   :  { %871 = vmatmul.mubr.bf16.gmra.mrb[40].mxu1 %v574_v52 }
 0x1cd   :  { %v776_v18 = vpop.f32.mrb[52].mxu0 }
 0x1ce   :  { %v777_v19 = vadd.f32 %v1514_v17, %v776_v18  ;;  %v778_v20 = vpop.f32.mrb[53].mxu0 }
 0x1cf   :  { %v779_v21 = vpop.f32.mrb[54].mxu0 }
 0x1d0   :  { %v878_v22 = vmax.f32 %v777_v19, 0.0  ;;  %v780_v23 = vadd.f32 %v1514_v17, %v779_v21  ;;  %v781_v24 = vpop.f32.mrb[55].mxu0 }
 0x1d2   :  { %904 = vst.msk [vmem:[%s1647_s6] sm:$0xff] %vm903_vm3, %v878_v22  ;;  %v879_v25 = vmax.f32 %v780_v23, 0.0 }
 0x1d4   :  { %905 = vst.msk [vmem:[%s1647_s6 + $0x8] sm:$0xff] %vm903_vm3, %v879_v25 }
 0x1d5   :  { %v784_v26 = vpop.f32.mrb[56].mxu0 }
 0x1d6   :  { %v785_v27 = vadd.f32 %v1514_v17, %v784_v26  ;;  %v786_v28 = vpop.f32.mrb[57].mxu0 }
 0x1d7   :  { %v787_v29 = vpop.f32.mrb[58].mxu0 }
 0x1d8   :  { %v880_v30 = vmax.f32 %v785_v27, 0.0  ;;  %v788_v31 = vadd.f32 %v1514_v17, %v787_v29  ;;  %v789_v32 = vpop.f32.mrb[59].mxu0 }
 0x1da   :  { %906 = vst.msk [vmem:[%s1647_s6 + $0x10] sm:$0xff] %vm903_vm3, %v880_v30  ;;  %v881_v33 = vmax.f32 %v788_v31, 0.0 }
 0x1dc   :  { %907 = vst.msk [vmem:[%s1647_s6 + $0x18] sm:$0xff] %vm903_vm3, %v881_v33 }
 0x1dd   :  { %v792_v34 = vpop.f32.mrb[0].mxu1 }
 0x1de   :  { %v793_v35 = vadd.f32 %v1514_v17, %v792_v34  ;;  %v794_v36 = vpop.f32.mrb[1].mxu1 }
 0x1df   :  { %v795_v37 = vpop.f32.mrb[2].mxu1 }
 0x1e0   :  { %v882_v38 = vmax.f32 %v793_v35, 0.0  ;;  %v796_v39 = vadd.f32 %v1514_v17, %v795_v37  ;;  %v797_v40 = vpop.f32.mrb[3].mxu1 }
 0x1e2   :  { %908 = vst.msk [vmem:[%s1647_s6 + $0x20] sm:$0xff] %vm903_vm3, %v882_v38  ;;  %v883_v41 = vmax.f32 %v796_v39, 0.0 }
 0x1e4   :  { %909 = vst.msk [vmem:[%s1647_s6 + $0x28] sm:$0xff] %vm903_vm3, %v883_v41 }
 0x1e5   :  { %v800_v42 = vpop.f32.mrb[4].mxu1 }
 0x1e6   :  { %v801_v43 = vadd.f32 %v1514_v17, %v800_v42  ;;  %v802_v44 = vpop.f32.mrb[5].mxu1 }
 0x1e7   :  { %v803_v45 = vpop.f32.mrb[6].mxu1 }
 0x1e8   :  { %v884_v46 = vmax.f32 %v801_v43, 0.0  ;;  %v804_v47 = vadd.f32 %v1514_v17, %v803_v45  ;;  %v805_v48 = vpop.f32.mrb[7].mxu1 }
 0x1ea   :  { %910 = vst.msk [vmem:[%s1647_s6 + $0x30] sm:$0xff] %vm903_vm3, %v884_v46  ;;  %v885_v49 = vmax.f32 %v804_v47, 0.0 }
 0x1ec   :  { %911 = vst.msk [vmem:[%s1647_s6 + $0x38] sm:$0xff] %vm903_vm3, %v885_v49 }
 0x1ed   :  { %v808_v50 = vpop.f32.mrb[8].mxu1 }
 0x1ee   :  { %v809_v53 = vadd.f32 %v1514_v17, %v808_v50  ;;  %v810_v54 = vpop.f32.mrb[9].mxu1 }
 0x1ef   :  { %v811_v55 = vpop.f32.mrb[10].mxu1 }
 0x1f0   :  { %v886_v56 = vmax.f32 %v809_v53, 0.0  ;;  %v812_v57 = vadd.f32 %v1514_v17, %v811_v55  ;;  %v813_v58 = vpop.f32.mrb[11].mxu1 }
 0x1f2   :  { %912 = vst.msk [vmem:[%s1647_s6 + $0x40] sm:$0xff] %vm903_vm3, %v886_v56  ;;  %v887_v59 = vmax.f32 %v812_v57, 0.0 }
 0x1f4   :  { %913 = vst.msk [vmem:[%s1647_s6 + $0x48] sm:$0xff] %vm903_vm3, %v887_v59 }
 0x1f5   :  { %v816_v60 = vpop.f32.mrb[12].mxu1 }
 0x1f6   :  { %v817_v61 = vadd.f32 %v1514_v17, %v816_v60  ;;  %v818_v62 = vpop.f32.mrb[13].mxu1 }
 0x1f7   :  { %v819_v63 = vpop.f32.mrb[14].mxu1 }
 0x1f8   :  { %v888_v0 = vmax.f32 %v817_v61, 0.0  ;;  %v820_v1 = vadd.f32 %v1514_v17, %v819_v63  ;;  %v821_v2 = vpop.f32.mrb[15].mxu1 }
 0x1fa   :  { %914 = vst.msk [vmem:[%s1647_s6 + $0x50] sm:$0xff] %vm903_vm3, %v888_v0  ;;  %v889_v3 = vmax.f32 %v820_v1, 0.0 }
 0x1fc   :  { %915 = vst.msk [vmem:[%s1647_s6 + $0x58] sm:$0xff] %vm903_vm3, %v889_v3 }
 0x1fd   :  { %v824_v4 = vpop.f32.mrb[16].mxu1 }
 0x1fe   :  { %v825_v5 = vadd.f32 %v1514_v17, %v824_v4  ;;  %v826_v6 = vpop.f32.mrb[17].mxu1 }
 0x1ff   :  { %v827_v7 = vpop.f32.mrb[18].mxu1 }
 0x200   :  { %v890_v8 = vmax.f32 %v825_v5, 0.0  ;;  %v828_v9 = vadd.f32 %v1514_v17, %v827_v7  ;;  %v829_v10 = vpop.f32.mrb[19].mxu1 }
 0x202   :  { %916 = vst.msk [vmem:[%s1647_s6 + $0x60] sm:$0xff] %vm903_vm3, %v890_v8  ;;  %v891_v11 = vmax.f32 %v828_v9, 0.0 }
 0x204   :  { %917 = vst.msk [vmem:[%s1647_s6 + $0x68] sm:$0xff] %vm903_vm3, %v891_v11 }
 0x205   :  { %v832_v12 = vpop.f32.mrb[20].mxu1 }
 0x206   :  { %v833_v13 = vadd.f32 %v1514_v17, %v832_v12  ;;  %v834_v14 = vpop.f32.mrb[21].mxu1 }
 0x207   :  { %v835_v51 = vpop.f32.mrb[22].mxu1 }
 0x208   :  { %v892_v15 = vmax.f32 %v833_v13, 0.0  ;;  %v836_v16 = vadd.f32 %v1514_v17, %v835_v51  ;;  %v837_v52 = vpop.f32.mrb[23].mxu1 }
 0x20a   :  { %918 = vst.msk [vmem:[%s1647_s6 + $0x70] sm:$0xff] %vm903_vm3, %v892_v15  ;;  %v893_v18 = vmax.f32 %v836_v16, 0.0 }
 0x20c   :  { %919 = vst.msk [vmem:[%s1647_s6 + $0x78] sm:$0xff] %vm903_vm3, %v893_v18 }
 0x20d   :  { %v840_v19 = vpop.f32.mrb[24].mxu1 }
 0x20e   :  { %v841_v20 = vadd.f32 %v1514_v17, %v840_v19  ;;  %v842_v21 = vpop.f32.mrb[25].mxu1 }
 0x20f   :  { %v843_v22 = vpop.f32.mrb[26].mxu1 }
 0x210   :  { %v894_v23 = vmax.f32 %v841_v20, 0.0  ;;  %v844_v24 = vadd.f32 %v1514_v17, %v843_v22  ;;  %v845_v25 = vpop.f32.mrb[27].mxu1 }
 0x212   :  { %920 = vst.msk [vmem:[%s1647_s6 + $0x80] sm:$0xff] %vm903_vm3, %v894_v23  ;;  %v895_v26 = vmax.f32 %v844_v24, 0.0 }
 0x214   :  { %921 = vst.msk [vmem:[%s1647_s6 + $0x88] sm:$0xff] %vm903_vm3, %v895_v26 }
 0x215   :  { %v848_v27 = vpop.f32.mrb[28].mxu1 }
 0x216   :  { %v849_v28 = vadd.f32 %v1514_v17, %v848_v27  ;;  %v850_v29 = vpop.f32.mrb[29].mxu1 }
 0x217   :  { %v851_v30 = vpop.f32.mrb[30].mxu1 }
 0x218   :  { %v896_v31 = vmax.f32 %v849_v28, 0.0  ;;  %v852_v32 = vadd.f32 %v1514_v17, %v851_v30  ;;  %v853_v33 = vpop.f32.mrb[31].mxu1 }
 0x21a   :  { %922 = vst.msk [vmem:[%s1647_s6 + $0x90] sm:$0xff] %vm903_vm3, %v896_v31  ;;  %v897_v34 = vmax.f32 %v852_v32, 0.0 }
 0x21c   :  { %923 = vst.msk [vmem:[%s1647_s6 + $0x98] sm:$0xff] %vm903_vm3, %v897_v34 }
 0x21d   :  { %v856_v35 = vpop.f32.mrb[32].mxu1 }
 0x21e   :  { %v857_v36 = vadd.f32 %v1514_v17, %v856_v35  ;;  %v858_v37 = vpop.f32.mrb[33].mxu1 }
 0x21f   :  { %v859_v38 = vpop.f32.mrb[34].mxu1 }
 0x220   :  { %v898_v39 = vmax.f32 %v857_v36, 0.0  ;;  %v860_v40 = vadd.f32 %v1514_v17, %v859_v38  ;;  %v861_v41 = vpop.f32.mrb[35].mxu1 }
 0x222   :  { %924 = vst.msk [vmem:[%s1647_s6 + $0xa0] sm:$0xff] %vm903_vm3, %v898_v39  ;;  %v899_v42 = vmax.f32 %v860_v40, 0.0 }
 0x224   :  { %925 = vst.msk [vmem:[%s1647_s6 + $0xa8] sm:$0xff] %vm903_vm3, %v899_v42 }
 0x225   :  { %v864_v43 = vpop.f32.mrb[36].mxu1 }
 0x226   :  { %v865_v44 = vadd.f32 %v1514_v17, %v864_v43  ;;  %v866_v45 = vpop.f32.mrb[37].mxu1 }
 0x227   :  { %v867_v46 = vpop.f32.mrb[38].mxu1 }
 0x228   :  { %v900_v47 = vmax.f32 %v865_v44, 0.0  ;;  %v868_v48 = vadd.f32 %v1514_v17, %v867_v46  ;;  %v869_v49 = vpop.f32.mrb[39].mxu1 }
 0x22a   :  { %926 = vst.msk [vmem:[%s1647_s6 + $0xb0] sm:$0xff] %vm903_vm3, %v900_v47  ;;  %v901_v50 = vmax.f32 %v868_v48, 0.0 }
 0x22c   :  { %927 = vst.msk [vmem:[%s1647_s6 + $0xb8] sm:$0xff] %vm903_vm3, %v901_v50 }
 0x22d   :  { %v872_v53 = vpop.f32.mrb[40].mxu1 }
 0x22e   :  { %v873_v54 = vadd.f32 %v1514_v17, %v872_v53  ;;  %v874_v55 = vpop.f32.mrb[41].mxu1 }
 0x22f   :  { %v875_v56 = vpop.f32.mrb[42].mxu1 }
 0x230   :  { %v902_v57 = vmax.f32 %v873_v54, 0.0  ;;  %v876_v58 = vpop.f32.mrb[43].mxu1 }
 0x232   :  { %928 = vst.msk [vmem:[%s1647_s6 + $0xc0] sm:$0xff] %vm903_vm3, %v902_v57 }

// kernel: d3qn_forward.3
= control target key start
LH: loop header
LB: loop body
LE: loop exit
PB: predicated region body
PF: predicated region fallthrough
CT: control target
= control target key end

     0   :  { %v2121_v9 = vmov 1983009808   ;;  %v38_v11 = vlaneseq  ;;  %vm1008_vm0 = vcmask 392192   ;;  %s2822_s0 = inlined_call_operand.vmem [shape: f32[2,1200], index: 0, kind: input, shape index: {}]   ;;  %s2823_s1 = inlined_call_operand.vmem [shape: bf16[1200,200], index: 1, kind: input, shape index: {}]   ;;  %s2824_s2 = inlined_call_operand.vmem [shape: f32[1,200], index: 2, kind: input, shape index: {}]   ;;  %s2825_s3 = inlined_call_operand.vmem [shape: bf16[200,200], index: 3, kind: input, shape index: {}]   ;;  %s2826_s4 = inlined_call_operand.vmem [shape: f32[1,200], index: 4, kind: input, shape index: {}]   ;;  %s2827_s5 = inlined_call_operand.vmem [shape: bf16[200,128], index: 5, kind: input, shape index: {}]   ;;  %s2828_s6 = inlined_call_operand.vmem [shape: f32[1,128], index: 6, kind: input, shape index: {}]   ;;  %s2829_s7 = inlined_call_operand.hbm [shape: f32[2,128], index: 7, kind: output, shape index: {}]  }
   0x1   :  { %v1819_v0 = vld [vmem:[%s2823_s1 + $0x104] ss:$8 sps:$4 sm:$0xff]   ;;  %v1821_v1 = vld [vmem:[%s2823_s1 + $0x100] ss:$8 sps:$4 sm:$0xff]   ;;  %v1822_v2 = vld [vmem:[%s2823_s1 + $0x114] ss:$8 sps:$4 sm:$0xff]   ;;  %v36_v10 = vunpack.c.l.s4 %v2121_v9 }
   0x2   :  { %1053 = vmatprep.subr.bf16.mxu0 %v1819_v0  ;;  %v1824_v3 = vld [vmem:[%s2823_s1 + $0x110] ss:$8 sps:$4 sm:$0xff]   ;;  %v1825_v4 = vld [vmem:[%s2823_s1 + $0x124] ss:$8 sps:$4 sm:$0xff]   ;;  %v1827_v5 = vld [vmem:[%s2823_s1 + $0x120] ss:$8 sps:$4 sm:$0xff]  }
   0x3   :  { %1054 = vmatpush1.bf16.msra.mxu0 %v1821_v1  ;;  %v1828_v6 = vld [vmem:[%s2823_s1 + $0x134] ss:$8 sps:$4 sm:$0xff]   ;;  %v1830_v7 = vld [vmem:[%s2823_s1 + $0x130] ss:$8 sps:$4 sm:$0xff]   ;;  %v1831_v8 = vld [vmem:[%s2823_s1 + $0x144] ss:$8 sps:$4 sm:$0xff]   ;;  %v37_v14 = vunpack.c.0.s8 %v36_v10 }
   0x4   :  { %1055 = vmatprep.subr.bf16.mxu0 %v1822_v2  ;;  %v1833_v12 = vld [vmem:[%s2823_s1 + $0x140] ss:$8 sps:$4 sm:$0xff]   ;;  %v1834_v13 = vld [vmem:[%s2823_s1 + $0x154] ss:$8 sps:$4 sm:$0xff]   ;;  %v2197_v15 = vshrl.u32 %v38_v11, 7 }
   0x5   :  { %v1836_v16 = vld [vmem:[%s2823_s1 + $0x150] ss:$8 sps:$4 sm:$0xff]   ;;  %v1837_v17 = vld [vmem:[%s2823_s1 + $0x164] ss:$8 sps:$4 sm:$0xff]   ;;  %v1839_v22 = vld [vmem:[%s2823_s1 + $0x160] ss:$8 sps:$4 sm:$0xff]  }
   0x6   :  { %v2206_v18 = vsub.s32 %v37_v14, %v2197_v15  ;;  %v28_v19 = vld [vmem:[%s2822_s0] sm:$0xff]  ;;  %v1840_v23 = vld [vmem:[%s2823_s1 + $0x174] ss:$8 sps:$4 sm:$0xff]   ;;  %v1842_v28 = vld [vmem:[%s2823_s1 + $0x170] ss:$8 sps:$4 sm:$0xff]  }
   0x7   :  { %1056 = vmatpush1.bf16.msra.mxu0 %v1824_v3  ;;  %v34_v20 = vcombine.high %v28_v19, %v28_v19  ;;  %v1843_v29 = vld [vmem:[%s2823_s1 + $0x184] ss:$8 sps:$4 sm:$0xff]   ;;  %v1885_v32 = vld [vmem:[%s2823_s1] ss:$8 sps:$4 sm:$0xff]   ;;  %v1846_v34 = vld [vmem:[%s2823_s1 + $0x194] ss:$8 sps:$4 sm:$0xff]  }
   0x8   :  { %1057 = vmatprep.subr.bf16.mxu0 %v1825_v4  ;;  %v2212_v21 = vrot.slane %v28_v19, %v2206_v18  ;;  %v1883_v31 = vld [vmem:[%s2823_s1 + $0x4] ss:$8 sps:$4 sm:$0xff]   ;;  %v1845_v33 = vld [vmem:[%s2823_s1 + $0x180] ss:$8 sps:$4 sm:$0xff]   ;;  %v1889_v35 = vld [vmem:[%s2823_s1 + $0x14] ss:$8 sps:$4 sm:$0xff]  }
   0x9   :  { %v2221_v24 = vrot.slane %v34_v20, %v2206_v18  ;;  %1012 = vmatprep.subr.bf16.mxu1 %v1883_v31  ;;  %v1891_v36 = vld [vmem:[%s2823_s1 + $0x10] ss:$8 sps:$4 sm:$0xff]   ;;  %v1895_v38 = vld [vmem:[%s2823_s1 + $0x24] ss:$8 sps:$4 sm:$0xff]   ;;  %v1897_v40 = vld [vmem:[%s2823_s1 + $0x20] ss:$8 sps:$4 sm:$0xff]  }
   0xa   :  { %v49_v25 = vcombine.high %v2212_v21, %v2212_v21  ;;  %1013 = vmatpush1.bf16.msra.mxu1 %v1885_v32  ;;  %v1848_v37 = vld [vmem:[%s2823_s1 + $0x190] ss:$8 sps:$4 sm:$0xff]   ;;  %v1849_v39 = vld [vmem:[%s2823_s1 + $0x1a4] ss:$8 sps:$4 sm:$0xff]   ;;  %v1901_v41 = vld [vmem:[%s2823_s1 + $0x34] ss:$8 sps:$4 sm:$0xff]  }
   0xb   :  { %1058 = vmatpush1.bf16.msra.mxu0 %v1827_v5  ;;  %v50_v26 = vcombine.high %v2221_v24, %v2221_v24  ;;  %1014 = vmatprep.subr.bf16.mxu1 %v1889_v35  ;;  %v1851_v42 = vld [vmem:[%s2823_s1 + $0x1a0] ss:$8 sps:$4 sm:$0xff]   ;;  %v1852_v43 = vld [vmem:[%s2823_s1 + $0x1b4] ss:$8 sps:$4 sm:$0xff]   ;;  %v1903_v44 = vld [vmem:[%s2823_s1 + $0x30] ss:$8 sps:$4 sm:$0xff]   ;;  %v88_v4 = vpack.c.bf16 %v2221_v24, %v2221_v24 }
   0xc   :  { %1059 = vmatprep.subr.bf16.mxu0 %v1828_v6  ;;  %v87_v27 = vpack.c.bf16 %v49_v25, %v49_v25  ;;  %v1907_v45 = vld [vmem:[%s2823_s1 + $0x44] ss:$8 sps:$4 sm:$0xff]   ;;  %v1854_v46 = vld [vmem:[%s2823_s1 + $0x1b0] ss:$8 sps:$4 sm:$0xff]   ;;  %v1909_v48 = vld [vmem:[%s2823_s1 + $0x40] ss:$8 sps:$4 sm:$0xff]  }
   0xd   :  { %v89_v30 = vpack.c.bf16 %v50_v26, %v50_v26  ;;  %v1855_v47 = vld [vmem:[%s2823_s1 + $0x1c4] ss:$8 sps:$4 sm:$0xff]   ;;  %v1913_v49 = vld [vmem:[%s2823_s1 + $0x54] ss:$8 sps:$4 sm:$0xff]   ;;  %v1857_v50 = vld [vmem:[%s2823_s1 + $0x1c0] ss:$8 sps:$4 sm:$0xff]  }
   0xe   :  { %1044 = vmatprep.mubr.bf16.mxu1 %v87_v27  ;;  %1015 = vmatpush1.bf16.msra.mxu1 %v1891_v36  ;;  %v1858_v51 = vld [vmem:[%s2823_s1 + $0x1d4] ss:$8 sps:$4 sm:$0xff]   ;;  %v1915_v52 = vld [vmem:[%s2823_s1 + $0x50] ss:$8 sps:$4 sm:$0xff]   ;;  %v1919_v53 = vld [vmem:[%s2823_s1 + $0x64] ss:$8 sps:$4 sm:$0xff]  }
   0xf   :  { %1060 = vmatpush1.bf16.msra.mxu0 %v1830_v7  ;;  %1085 = vmatprep.mubr.bf16.mxu0 %v89_v30  ;;  %v1860_v54 = vld [vmem:[%s2823_s1 + $0x1d0] ss:$8 sps:$4 sm:$0xff]   ;;  %v1861_v55 = vld [vmem:[%s2823_s1 + $0x1e4] ss:$8 sps:$4 sm:$0xff]   ;;  %v1921_v56 = vld [vmem:[%s2823_s1 + $0x60] ss:$8 sps:$4 sm:$0xff]  }
  0x10   :  { %1061 = vmatprep.subr.bf16.mxu0 %v1831_v8  ;;  %1016 = vmatprep.subr.bf16.mxu1 %v1895_v38  ;;  %v1925_v57 = vld [vmem:[%s2823_s1 + $0x74] ss:$8 sps:$4 sm:$0xff]   ;;  %v1863_v58 = vld [vmem:[%s2823_s1 + $0x1e0] ss:$8 sps:$4 sm:$0xff]   ;;  %v1927_v60 = vld [vmem:[%s2823_s1 + $0x70] ss:$8 sps:$4 sm:$0xff]  }
  0x11   :  { %v1864_v59 = vld [vmem:[%s2823_s1 + $0x1f4] ss:$8 sps:$4 sm:$0xff]   ;;  %v1931_v61 = vld [vmem:[%s2823_s1 + $0x84] ss:$8 sps:$4 sm:$0xff]   ;;  %v1866_v62 = vld [vmem:[%s2823_s1 + $0x1f0] ss:$8 sps:$4 sm:$0xff]  }
  0x12   :  { %1017 = vmatpush1.bf16.msra.mxu1 %v1897_v40  ;;  %v2332_v63 = vld [vmem:[%s2822_s0 + $0x8] sm:$0xff]  ;;  %v1937_v3 = vld [vmem:[%s2823_s1 + $0x94] ss:$8 sps:$4 sm:$0xff]   ;;  %v1939_v8 = vld [vmem:[%s2823_s1 + $0x90] ss:$8 sps:$4 sm:$0xff]  }
  0x13   :  { %1062 = vmatpush1.bf16.msra.mxu0 %v1833_v12  ;;  %1018 = vmatprep.subr.bf16.mxu1 %v1901_v41  ;;  %v1870_v0 = vld [vmem:[%s2823_s1 + $0x204] ss:$8 sps:$4 sm:$0xff]   ;;  %v1933_v1 = vld [vmem:[%s2823_s1 + $0x80] ss:$8 sps:$4 sm:$0xff]   ;;  %v2342_v2 = vrot.slane %v2332_v63, %v2206_v18  ;;  %v1873_v7 = vld [vmem:[%s2823_s1 + $0x214] ss:$8 sps:$4 sm:$0xff]  }
  0x14   :  { %1063 = vmatprep.subr.bf16.mxu0 %v1834_v13  ;;  %v1868_v6 = vld [vmem:[%s2823_s1 + $0x200] ss:$8 sps:$4 sm:$0xff]   ;;  %v1943_v10 = vld [vmem:[%s2823_s1 + $0xa4] ss:$8 sps:$4 sm:$0xff]   ;;  %v1871_v11 = vld [vmem:[%s2823_s1 + $0x210] ss:$8 sps:$4 sm:$0xff]  }
  0x15   :  { %v66_v5 = vcombine.high %v2342_v2, %v2342_v2  ;;  %v1876_v12 = vld [vmem:[%s2823_s1 + $0x224] ss:$8 sps:$4 sm:$0xff]   ;;  %v1945_v13 = vld [vmem:[%s2823_s1 + $0xa0] ss:$8 sps:$4 sm:$0xff]   ;;  %v1949_v14 = vld [vmem:[%s2823_s1 + $0xb4] ss:$8 sps:$4 sm:$0xff]  }
  0x16   :  { %1019 = vmatpush1.bf16.msra.mxu1 %v1903_v44  ;;  %v1951_v19 = vld [vmem:[%s2823_s1 + $0xb0] ss:$8 sps:$4 sm:$0xff]   ;;  %v1955_v20 = vld [vmem:[%s2823_s1 + $0xc4] ss:$8 sps:$4 sm:$0xff]   ;;  %v1957_v24 = vld [vmem:[%s2823_s1 + $0xc0] ss:$8 sps:$4 sm:$0xff]  }
  0x17   :  { %1064 = vmatpush1.bf16.msra.mxu0 %v1836_v16  ;;  %1020 = vmatprep.subr.bf16.mxu1 %v1907_v45  ;;  %v91_v9 = vpack.c.bf16 %v66_v5, %v66_v5  ;;  %v1874_v16 = vld [vmem:[%s2823_s1 + $0x220] ss:$8 sps:$4 sm:$0xff]   ;;  %v1961_v25 = vld [vmem:[%s2823_s1 + $0xd4] ss:$8 sps:$4 sm:$0xff]   ;;  %v1886_v30 = vld [vmem:[%s2823_s1 + $0x250] ss:$8 sps:$4 sm:$0xff]  }
  0x18   :  { %1065 = vmatprep.subr.bf16.mxu0 %v1837_v17  ;;  %v1879_v17 = vld [vmem:[%s2823_s1 + $0x234] ss:$8 sps:$4 sm:$0xff]   ;;  %v1880_v26 = vld [vmem:[%s2823_s1 + $0x240] ss:$8 sps:$4 sm:$0xff]   ;;  %v1894_v31 = vld [vmem:[%s2823_s1 + $0x264] ss:$8 sps:$4 sm:$0xff]  }
  0x19   :  { %v1888_v27 = vld [vmem:[%s2823_s1 + $0x254] ss:$8 sps:$4 sm:$0xff]   ;;  %v1969_v32 = vld [vmem:[%s2823_s1 + $0xe0] ss:$8 sps:$4 sm:$0xff]   ;;  %v1975_v36 = vld [vmem:[%s2823_s1 + $0xf0] ss:$8 sps:$4 sm:$0xff]  }
  0x1a   :  { %1021 = vmatpush1.bf16.msra.mxu1 %v1909_v48  ;;  %v1900_v35 = vld [vmem:[%s2823_s1 + $0x274] ss:$8 sps:$4 sm:$0xff]   ;;  %v1898_v38 = vld [vmem:[%s2823_s1 + $0x270] ss:$8 sps:$4 sm:$0xff]   ;;  %v1906_v40 = vld [vmem:[%s2823_s1 + $0x284] ss:$8 sps:$4 sm:$0xff]  }
  0x1b   :  { %1066 = vmatpush1.bf16.msra.mxu0 %v1839_v22  ;;  %1022 = vmatprep.subr.bf16.mxu1 %v1913_v49  ;;  %v1877_v22 = vld [vmem:[%s2823_s1 + $0x230] ss:$8 sps:$4 sm:$0xff]   ;;  %v1979_v41 = vld [vmem:[%s2823_s1 + $0x400] ss:$8 sps:$4 sm:$0xff]   ;;  %v1993_v45 = vld [vmem:[%s2823_s1 + $0x424] ss:$8 sps:$4 sm:$0xff]  }
  0x1c   :  { %1067 = vmatprep.subr.bf16.mxu0 %v1840_v23  ;;  %v1882_v23 = vld [vmem:[%s2823_s1 + $0x244] ss:$8 sps:$4 sm:$0xff]   ;;  %v1985_v44 = vld [vmem:[%s2823_s1 + $0x410] ss:$8 sps:$4 sm:$0xff]   ;;  %v1991_v48 = vld [vmem:[%s2823_s1 + $0x420] ss:$8 sps:$4 sm:$0xff]  }
  0x1d   :  { %v1999_v49 = vld [vmem:[%s2823_s1 + $0x434] ss:$8 sps:$4 sm:$0xff]   ;;  %v2015_v5 = vld [vmem:[%s2823_s1 + $0x460] ss:$8 sps:$4 sm:$0xff]  }
  0x1e   :  { %1023 = vmatpush1.bf16.msra.mxu1 %v1915_v52  ;;  %v1924_v52 = vld [vmem:[%s2823_s1 + $0x2b4] ss:$8 sps:$4 sm:$0xff]  }
  0x1f   :  { %1068 = vmatpush1.bf16.msra.mxu0 %v1842_v28  ;;  %1024 = vmatprep.subr.bf16.mxu1 %v1919_v53  ;;  %v1963_v28 = vld [vmem:[%s2823_s1 + $0xd0] ss:$8 sps:$4 sm:$0xff]  }
  0x20   :  { %1069 = vmatprep.subr.bf16.mxu0 %v1843_v29  ;;  %v1967_v29 = vld [vmem:[%s2823_s1 + $0xe4] ss:$8 sps:$4 sm:$0xff]   ;;  %v1997_v53 = vld [vmem:[%s2823_s1 + $0x430] ss:$8 sps:$4 sm:$0xff]  }
  0x22   :  { %1025 = vmatpush1.bf16.msra.mxu1 %v1921_v56 }
  0x23   :  { %1070 = vmatpush1.bf16.msra.mxu0 %v1845_v33  ;;  %1026 = vmatprep.subr.bf16.mxu1 %v1925_v57  ;;  %v1973_v33 = vld [vmem:[%s2823_s1 + $0xf4] ss:$8 sps:$4 sm:$0xff]   ;;  %v1922_v57 = vld [vmem:[%s2823_s1 + $0x2b0] ss:$8 sps:$4 sm:$0xff]  }
  0x24   :  { %1071 = vmatprep.subr.bf16.mxu0 %v1846_v34  ;;  %v1892_v34 = vld [vmem:[%s2823_s1 + $0x260] ss:$8 sps:$4 sm:$0xff]  }
  0x26   :  { %1027 = vmatpush1.bf16.msra.mxu1 %v1927_v60  ;;  %v2011_v60 = vld [vmem:[%s2823_s1 + $0x454] ss:$8 sps:$4 sm:$0xff]  }
  0x27   :  { %1072 = vmatpush1.bf16.msra.mxu0 %v1848_v37  ;;  %1028 = vmatprep.subr.bf16.mxu1 %v1931_v61  ;;  %v1981_v37 = vld [vmem:[%s2823_s1 + $0x404] ss:$8 sps:$4 sm:$0xff]   ;;  %v1928_v61 = vld [vmem:[%s2823_s1 + $0x2c0] ss:$8 sps:$4 sm:$0xff]  }
  0x28   :  { %1073 = vmatprep.subr.bf16.mxu0 %v1849_v39  ;;  %v86_v39 = vpack.c.bf16 %v2212_v21, %v2212_v21  ;;  %v1904_v21 = vld [vmem:[%s2823_s1 + $0x280] ss:$8 sps:$4 sm:$0xff]  }
  0x2a   :  { %1029 = vmatpush1.bf16.msra.mxu1 %v1933_v1  ;;  %v2017_v1 = vld [vmem:[%s2823_s1 + $0x464] ss:$8 sps:$4 sm:$0xff]  }
  0x2b   :  { %1074 = vmatpush1.bf16.msra.mxu0 %v1851_v42  ;;  %1030 = vmatprep.subr.bf16.mxu1 %v1937_v3  ;;  %v1987_v42 = vld [vmem:[%s2823_s1 + $0x414] ss:$8 sps:$4 sm:$0xff]   ;;  %v1934_v3 = vld [vmem:[%s2823_s1 + $0x2d0] ss:$8 sps:$4 sm:$0xff]  }
  0x2c   :  { %1075 = vmatprep.subr.bf16.mxu0 %v1852_v43  ;;  %v1912_v43 = vld [vmem:[%s2823_s1 + $0x294] ss:$8 sps:$4 sm:$0xff]  }
  0x2e   :  { %1031 = vmatpush1.bf16.msra.mxu1 %v1939_v8 }
  0x2f   :  { %1076 = vmatpush1.bf16.msra.mxu0 %v1854_v46  ;;  %1032 = vmatprep.subr.bf16.mxu1 %v1943_v10  ;;  %v1910_v46 = vld [vmem:[%s2823_s1 + $0x290] ss:$8 sps:$4 sm:$0xff]  }
  0x30   :  { %1077 = vmatprep.subr.bf16.mxu0 %v1855_v47  ;;  %v1918_v47 = vld [vmem:[%s2823_s1 + $0x2a4] ss:$8 sps:$4 sm:$0xff]  }
  0x32   :  { %1033 = vmatpush1.bf16.msra.mxu1 %v1945_v13 }
  0x33   :  { %1078 = vmatpush1.bf16.msra.mxu0 %v1857_v50  ;;  %1034 = vmatprep.subr.bf16.mxu1 %v1949_v14  ;;  %v1916_v50 = vld [vmem:[%s2823_s1 + $0x2a0] ss:$8 sps:$4 sm:$0xff]  }
  0x34   :  { %1079 = vmatprep.subr.bf16.mxu0 %v1858_v51  ;;  %v2479_v51 = vld.sshfl [vmem:[%s2822_s0 + $0x10] sm:$0x33 pattern:$0x76325410] }
  0x36   :  { %1035 = vmatpush1.bf16.msra.mxu1 %v1951_v19 }
  0x37   :  { %1080 = vmatpush1.bf16.msra.mxu0 %v1860_v54  ;;  %1036 = vmatprep.subr.bf16.mxu1 %v1955_v20  ;;  %v75_v54 = vcombine.high %v2479_v51, %v2479_v51 }
  0x38   :  { %1081 = vmatprep.subr.bf16.mxu0 %v1861_v55  ;;  %v2005_v55 = vld [vmem:[%s2823_s1 + $0x444] ss:$8 sps:$4 sm:$0xff]  }
  0x39   :  { %v95_v56 = vpack.c.bf16 %v75_v54, %v75_v54 }
  0x3a   :  { %1037 = vmatpush1.bf16.msra.mxu1 %v1957_v24 }
  0x3b   :  { %1082 = vmatpush1.bf16.msra.mxu0 %v1863_v58  ;;  %1038 = vmatprep.subr.bf16.mxu1 %v1961_v25  ;;  %v1930_v58 = vld [vmem:[%s2823_s1 + $0x2c4] ss:$8 sps:$4 sm:$0xff]  }
  0x3c   :  { %1083 = vmatprep.subr.bf16.mxu0 %v1864_v59  ;;  %v2003_v59 = vld [vmem:[%s2823_s1 + $0x440] ss:$8 sps:$4 sm:$0xff]  }
  0x3e   :  { %1039 = vmatpush1.bf16.msra.mxu1 %v1963_v28 }
  0x3f   :  { %1084 = vmatpush1.bf16.msra.mxu0 %v1866_v62  ;;  %1040 = vmatprep.subr.bf16.mxu1 %v1967_v29  ;;  %v1936_v62 = vld [vmem:[%s2823_s1 + $0x2d4] ss:$8 sps:$4 sm:$0xff]  }
  0x40   :  { %1094 = vmatprep.subr.bf16.mxu0 %v1870_v0  ;;  %v2009_v0 = vld [vmem:[%s2823_s1 + $0x450] ss:$8 sps:$4 sm:$0xff]  }
  0x42   :  { %1086 = vmatmul.mubr.bf16.vlgmr.msra.gmra.mrb[0].mxu0 %v88_v4  ;;  %1041 = vmatpush1.bf16.msra.mxu1 %v1969_v32  ;;  %v1942_v4 = vld [vmem:[%s2823_s1 + $0x2e4] ss:$8 sps:$4 sm:$0xff]  }
  0x43   :  { %1095 = vmatpush1.bf16.msra.mxu0 %v1868_v6  ;;  %1126 = vmatprep.mubr.bf16.mxu0 %v91_v9  ;;  %v2023_v6 = vld [vmem:[%s2823_s1 + $0x474] ss:$8 sps:$4 sm:$0xff]  }
  0x44   :  { %1096 = vmatprep.subr.bf16.mxu0 %v1873_v7  ;;  %1042 = vmatprep.subr.bf16.mxu1 %v1973_v33  ;;  %v51_v7 = vcombine.high %v2332_v63, %v2332_v63 }
  0x46   :  { %1043 = vmatpush1.bf16.msra.mxu1 %v1975_v36 }
  0x47   :  { %1097 = vmatpush1.bf16.msra.mxu0 %v1871_v11  ;;  %1176 = vmatprep.subr.bf16.mxu1 %v1981_v37 }
  0x48   :  { %1098 = vmatprep.subr.bf16.mxu0 %v1876_v12 }
  0x49   :  { %1045 = vmatmul.mubr.bf16.vlgmr.msra.gmra.mrb[0].mxu1 %v86_v39 }
  0x4a   :  { %1177 = vmatpush1.bf16.msra.mxu1 %v1979_v41  ;;  %1758 = vmatprep.mubr.msk.bf16.mxu1 %vm1008_vm0, %v95_v56 }
  0x4b   :  { %1099 = vmatpush1.bf16.msra.mxu0 %v1874_v16  ;;  %1178 = vmatprep.subr.bf16.mxu1 %v1987_v42 }
  0x4c   :  { %1100 = vmatprep.subr.bf16.mxu0 %v1879_v17 }
  0x4e   :  { %1179 = vmatpush1.bf16.msra.mxu1 %v1985_v44 }
  0x4f   :  { %1101 = vmatpush1.bf16.msra.mxu0 %v1877_v22  ;;  %1180 = vmatprep.subr.bf16.mxu1 %v1993_v45 }
  0x50   :  { %1102 = vmatprep.subr.bf16.mxu0 %v1882_v23 }
  0x52   :  { %1181 = vmatpush1.bf16.msra.mxu1 %v1991_v48 }
  0x53   :  { %1103 = vmatpush1.bf16.msra.mxu0 %v1880_v26  ;;  %1182 = vmatprep.subr.bf16.mxu1 %v1999_v49 }
  0x54   :  { %1104 = vmatprep.subr.bf16.mxu0 %v1888_v27 }
  0x56   :  { %1183 = vmatpush1.bf16.msra.mxu1 %v1997_v53 }
  0x57   :  { %1105 = vmatpush1.bf16.msra.mxu0 %v1886_v30  ;;  %1184 = vmatprep.subr.bf16.mxu1 %v2005_v55 }
  0x58   :  { %1106 = vmatprep.subr.bf16.mxu0 %v1894_v31 }
  0x5a   :  { %1185 = vmatpush1.bf16.msra.mxu1 %v2003_v59 }
  0x5b   :  { %1107 = vmatpush1.bf16.msra.mxu0 %v1892_v34  ;;  %1186 = vmatprep.subr.bf16.mxu1 %v2011_v60 }
  0x5c   :  { %1108 = vmatprep.subr.bf16.mxu0 %v1900_v35 }
  0x5e   :  { %1187 = vmatpush1.bf16.msra.mxu1 %v2009_v0 }
  0x5f   :  { %1109 = vmatpush1.bf16.msra.mxu0 %v1898_v38  ;;  %1188 = vmatprep.subr.bf16.mxu1 %v2017_v1 }
  0x60   :  { %1110 = vmatprep.subr.bf16.mxu0 %v1906_v40 }
  0x63   :  { %1111 = vmatpush1.bf16.msra.mxu0 %v1904_v21 }
  0x64   :  { %1112 = vmatprep.subr.bf16.mxu0 %v1912_v43 }
  0x67   :  { %1113 = vmatpush1.bf16.msra.mxu0 %v1910_v46 }
  0x68   :  { %1114 = vmatprep.subr.bf16.mxu0 %v1918_v47 }
  0x6b   :  { %1115 = vmatpush1.bf16.msra.mxu0 %v1916_v50 }
  0x6c   :  { %1116 = vmatprep.subr.bf16.mxu0 %v1924_v52 }
  0x6f   :  { %1117 = vmatpush1.bf16.msra.mxu0 %v1922_v57 }
  0x70   :  { %1118 = vmatprep.subr.bf16.mxu0 %v1930_v58 }
  0x73   :  { %1119 = vmatpush1.bf16.msra.mxu0 %v1928_v61 }
  0x74   :  { %1120 = vmatprep.subr.bf16.mxu0 %v1936_v62 }
  0x75   :  { %12 = vsyncpa [#allocation3], 0  ;;  %v1940_v8 = vld [vmem:[%s2823_s1 + $0x2e0] ss:$8 sps:$4 sm:$0xff]   ;;  %v2534_v9 = vrot.slane %v51_v7, %v2206_v18  ;;  %v1948_v10 = vld [vmem:[%s2823_s1 + $0x2f4] ss:$8 sps:$4 sm:$0xff]   ;;  %1189 = vmatpush1.bf16.msra.mxu1 %v2015_v5  ;;  %v90_v17 = vpack.c.bf16 %v2342_v2, %v2342_v2  ;;  %v94_v28 = vpack.c.bf16 %v2479_v51, %v2479_v51 }
  0x76   :  { %v2021_v63 = vld [vmem:[%s2823_s1 + $0x470] ss:$8 sps:$4 sm:$0xff]   ;;  %1190 = vmatprep.subr.bf16.mxu1 %v2023_v6  ;;  %v2029_v11 = vld [vmem:[%s2823_s1 + $0x484] ss:$8 sps:$4 sm:$0xff]   ;;  %v2027_v14 = vld [vmem:[%s2823_s1 + $0x480] ss:$8 sps:$4 sm:$0xff]  }
  0x77   :  { %1121 = vmatpush1.bf16.msra.mxu0 %v1934_v3  ;;  %v1946_v18 = vld [vmem:[%s2823_s1 + $0x2f0] ss:$8 sps:$4 sm:$0xff]   ;;  %v67_v12 = vcombine.high %v2534_v9, %v2534_v9  ;;  %v1954_v13 = vld [vmem:[%s2823_s1 + $0x304] ss:$8 sps:$4 sm:$0xff]   ;;  %v2035_v16 = vld [vmem:[%s2823_s1 + $0x494] ss:$8 sps:$4 sm:$0xff]   ;;  %v92_v61 = vpack.c.bf16 %v2534_v9, %v2534_v9 }
  0x78   :  { %1122 = vmatprep.subr.bf16.mxu0 %v1942_v4  ;;  %v1952_v19 = vld [vmem:[%s2823_s1 + $0x300] ss:$8 sps:$4 sm:$0xff]   ;;  %v1960_v22 = vld [vmem:[%s2823_s1 + $0x314] ss:$8 sps:$4 sm:$0xff]   ;;  %v2033_v23 = vld [vmem:[%s2823_s1 + $0x490] ss:$8 sps:$4 sm:$0xff]  }
  0x79   :  { %1191 = vmatpush1.bf16.msra.mxu1 %v2021_v63  ;;  %v93_v20 = vpack.c.bf16 %v67_v12, %v67_v12  ;;  %v2041_v2 = vld [vmem:[%s2823_s1 + $0x4a4] ss:$8 sps:$4 sm:$0xff]   ;;  %v1958_v24 = vld [vmem:[%s2823_s1 + $0x310] ss:$8 sps:$4 sm:$0xff]   ;;  %v2039_v26 = vld [vmem:[%s2823_s1 + $0x4a0] ss:$8 sps:$4 sm:$0xff]  }
  0x7a   :  { %1192 = vmatprep.subr.bf16.mxu1 %v2029_v11  ;;  %v1966_v25 = vld [vmem:[%s2823_s1 + $0x324] ss:$8 sps:$4 sm:$0xff]   ;;  %v1964_v27 = vld [vmem:[%s2823_s1 + $0x320] ss:$8 sps:$4 sm:$0xff]   ;;  %v1972_v29 = vld [vmem:[%s2823_s1 + $0x334] ss:$8 sps:$4 sm:$0xff]  }
  0x7b   :  { %1123 = vmatpush1.bf16.msra.mxu0 %v1940_v8  ;;  %v1970_v30 = vld [vmem:[%s2823_s1 + $0x330] ss:$8 sps:$4 sm:$0xff]   ;;  %v1978_v31 = vld [vmem:[%s2823_s1 + $0x344] ss:$8 sps:$4 sm:$0xff]   ;;  %v1976_v32 = vld [vmem:[%s2823_s1 + $0x340] ss:$8 sps:$4 sm:$0xff]  }
  0x7c   :  { %1124 = vmatprep.subr.bf16.mxu0 %v1948_v10  ;;  %v1984_v33 = vld [vmem:[%s2823_s1 + $0x354] ss:$8 sps:$4 sm:$0xff]   ;;  %v1982_v34 = vld [vmem:[%s2823_s1 + $0x350] ss:$8 sps:$4 sm:$0xff]   ;;  %v1990_v35 = vld [vmem:[%s2823_s1 + $0x364] ss:$8 sps:$4 sm:$0xff]  }
  0x7d   :  { %1193 = vmatpush1.bf16.msra.mxu1 %v2027_v14  ;;  %v1988_v36 = vld [vmem:[%s2823_s1 + $0x360] ss:$8 sps:$4 sm:$0xff]   ;;  %v1996_v37 = vld [vmem:[%s2823_s1 + $0x374] ss:$8 sps:$4 sm:$0xff]   ;;  %v1994_v38 = vld [vmem:[%s2823_s1 + $0x370] ss:$8 sps:$4 sm:$0xff]  }
  0x7e   :  { %1194 = vmatprep.subr.bf16.mxu1 %v2035_v16  ;;  %v2002_v39 = vld [vmem:[%s2823_s1 + $0x384] ss:$8 sps:$4 sm:$0xff]   ;;  %v2000_v40 = vld [vmem:[%s2823_s1 + $0x380] ss:$8 sps:$4 sm:$0xff]   ;;  %v2008_v41 = vld [vmem:[%s2823_s1 + $0x394] ss:$8 sps:$4 sm:$0xff]  }
  0x7f   :  { %1125 = vmatpush1.bf16.msra.mxu0 %v1946_v18  ;;  %v2006_v42 = vld [vmem:[%s2823_s1 + $0x390] ss:$8 sps:$4 sm:$0xff]   ;;  %v2014_v21 = vld [vmem:[%s2823_s1 + $0x3a4] ss:$8 sps:$4 sm:$0xff]   ;;  %v2012_v43 = vld [vmem:[%s2823_s1 + $0x3a0] ss:$8 sps:$4 sm:$0xff]  }
  0x80   :  { %1135 = vmatprep.subr.bf16.mxu0 %v1954_v13  ;;  %v2020_v44 = vld [vmem:[%s2823_s1 + $0x3b4] ss:$8 sps:$4 sm:$0xff]   ;;  %v2018_v45 = vld [vmem:[%s2823_s1 + $0x3b0] ss:$8 sps:$4 sm:$0xff]   ;;  %v2026_v46 = vld [vmem:[%s2823_s1 + $0x3c4] ss:$8 sps:$4 sm:$0xff]  }
  0x81   :  { %1195 = vmatpush1.bf16.msra.mxu1 %v2033_v23  ;;  %v2024_v47 = vld [vmem:[%s2823_s1 + $0x3c0] ss:$8 sps:$4 sm:$0xff]   ;;  %v2032_v48 = vld [vmem:[%s2823_s1 + $0x3d4] ss:$8 sps:$4 sm:$0xff]   ;;  %v2030_v49 = vld [vmem:[%s2823_s1 + $0x3d0] ss:$8 sps:$4 sm:$0xff]  }
  0x82   :  { %1127 = vmatmul.mubr.bf16.vlgmr.msra.gmra.mrb[0].mxu0 %v90_v17  ;;  %1196 = vmatprep.subr.bf16.mxu1 %v2041_v2  ;;  %v2038_v50 = vld [vmem:[%s2823_s1 + $0x3e4] ss:$8 sps:$4 sm:$0xff]   ;;  %v2046_v51 = vld [vmem:[%s2825_s3] ss:$8 sps:$4 sm:$0xff]   ;;  %v2051_v53 = vld [vmem:[%s2825_s3 + $0x14] ss:$8 sps:$4 sm:$0xff]  }
  0x83   :  { %1136 = vmatpush1.bf16.msra.mxu0 %v1952_v19  ;;  %1167 = vmatprep.mubr.bf16.mxu0 %v93_v20  ;;  %v2048_v52 = vld [vmem:[%s2825_s3 + $0x4] ss:$8 sps:$4 sm:$0xff]   ;;  %v2036_v54 = vld [vmem:[%s2823_s1 + $0x3e0] ss:$8 sps:$4 sm:$0xff]   ;;  %v2044_v55 = vld [vmem:[%s2823_s1 + $0x3f4] ss:$8 sps:$4 sm:$0xff]  }
  0x84   :  { %1137 = vmatprep.subr.bf16.mxu0 %v1960_v22  ;;  %v2049_v56 = vld [vmem:[%s2825_s3 + $0x10] ss:$8 sps:$4 sm:$0xff]   ;;  %v2054_v57 = vld [vmem:[%s2825_s3 + $0x24] ss:$8 sps:$4 sm:$0xff]   ;;  %v2052_v59 = vld [vmem:[%s2825_s3 + $0x20] ss:$8 sps:$4 sm:$0xff]  }
  0x85   :  { %1197 = vmatpush1.bf16.msra.mxu1 %v2039_v26  ;;  %v2042_v58 = vld [vmem:[%s2823_s1 + $0x3f0] ss:$8 sps:$4 sm:$0xff]   ;;  %v2057_v60 = vld [vmem:[%s2825_s3 + $0x34] ss:$8 sps:$4 sm:$0xff]   ;;  %v2060_v0 = vld [vmem:[%s2825_s3 + $0x44] ss:$8 sps:$4 sm:$0xff]  }
  0x86   :  { %1394 = vmatprep.subr.bf16.mxu1 %v2048_v52  ;;  %v2055_v62 = vld [vmem:[%s2825_s3 + $0x30] ss:$8 sps:$4 sm:$0xff]   ;;  %v2058_v1 = vld [vmem:[%s2825_s3 + $0x40] ss:$8 sps:$4 sm:$0xff]   ;;  %v2063_v3 = vld [vmem:[%s2825_s3 + $0x54] ss:$8 sps:$4 sm:$0xff]  }
  0x87   :  { %1138 = vmatpush1.bf16.msra.mxu0 %v1958_v24  ;;  %v2061_v4 = vld [vmem:[%s2825_s3 + $0x50] ss:$8 sps:$4 sm:$0xff]   ;;  %v2066_v5 = vld [vmem:[%s2825_s3 + $0x64] ss:$8 sps:$4 sm:$0xff]   ;;  %v2064_v6 = vld [vmem:[%s2825_s3 + $0x60] ss:$8 sps:$4 sm:$0xff]  }
  0x88   :  { %1139 = vmatprep.subr.bf16.mxu0 %v1966_v25  ;;  %1209 = vmatmul.mubr.bf16.vlgmr.msra.gmra.mrb[4].mxu1 %v94_v28  ;;  %v2069_v7 = vld [vmem:[%s2825_s3 + $0x74] ss:$8 sps:$4 sm:$0xff]   ;;  %v2067_v8 = vld [vmem:[%s2825_s3 + $0x70] ss:$8 sps:$4 sm:$0xff]   ;;  %v2072_v9 = vld [vmem:[%s2825_s3 + $0x84] ss:$8 sps:$4 sm:$0xff]  }
  0x89   :  { %1395 = vmatpush1.bf16.msra.mxu1 %v2046_v51  ;;  %v2070_v10 = vld [vmem:[%s2825_s3 + $0x80] ss:$8 sps:$4 sm:$0xff]   ;;  %v2075_v63 = vld [vmem:[%s2825_s3 + $0x94] ss:$8 sps:$4 sm:$0xff]   ;;  %v2073_v11 = vld [vmem:[%s2825_s3 + $0x90] ss:$8 sps:$4 sm:$0xff]  }
  0x8a   :  { %1396 = vmatprep.subr.bf16.mxu1 %v2051_v53  ;;  %v2076_v18 = vld [vmem:[%s2825_s3 + $0xa0] ss:$8 sps:$4 sm:$0xff]   ;;  %v2078_v12 = vld [vmem:[%s2825_s3 + $0xa4] ss:$8 sps:$4 sm:$0xff]   ;;  %v2081_v13 = vld [vmem:[%s2825_s3 + $0xb4] ss:$8 sps:$4 sm:$0xff]  }
  0x8b   :  { %1140 = vmatpush1.bf16.msra.mxu0 %v1964_v27  ;;  %v2079_v14 = vld [vmem:[%s2825_s3 + $0xb0] ss:$8 sps:$4 sm:$0xff]   ;;  %v1245_v16 = vld [vmem:[%s2825_s3 + $0xc0] sm:$0xff]  ;;  %vm1387_vm1 = vcmask 1043456   ;;  %v2122_v22 = vmov 0   ;;  %vm1383_vm2 = vcmask 588800  }
  0x8c   :  { %1141 = vmatprep.subr.bf16.mxu0 %v1972_v29  ;;  %v1784_v17 = vcombine.high %v1245_v16, %v1245_v16  ;;  %v1783_v19 = vcombine.low %v1245_v16, %v1245_v16  ;;  %v2088_v51 = vld [vmem:[%s2827_s5 + $0x20] sm:$0xff]   ;;  %v2089_v52 = vld [vmem:[%s2827_s5 + $0x28] sm:$0xff]   ;;  %v2090_v53 = vld [vmem:[%s2827_s5 + $0x30] sm:$0xff]  }
  0x8d   :  { %1397 = vmatpush1.bf16.msra.mxu1 %v2049_v56  ;;  %v2093_v56 = vld [vmem:[%s2827_s5 + $0x48] sm:$0xff]  }
  0x8e   :  { %1398 = vmatprep.subr.bf16.mxu1 %v2054_v57  ;;  %v1389_v20 = vsel %vm1387_vm1, %v1783_v19, 0  ;;  %v2094_v57 = vld [vmem:[%s2827_s5 + $0x50] sm:$0xff]  }
  0x8f   :  { %1142 = vmatpush1.bf16.msra.mxu0 %v1970_v30  ;;  %v250_v30 = vsub.s32 0, %v2197_v15 }
  0x90   :  { %1143 = vmatprep.subr.bf16.mxu0 %v1978_v31  ;;  %v246_v31 = vld [vmem:[%s2824_s2] sm:$0x3] }
  0x91   :  { %1399 = vmatpush1.bf16.msra.mxu1 %v2052_v59  ;;  %v2096_v59 = vld [vmem:[%s2827_s5 + $0x60] ss:$0 sps:$4 sm:$0xff]  }
  0x92   :  { %1400 = vmatprep.subr.bf16.mxu1 %v2057_v60  ;;  %v1550_v60 = vsel %vm1387_vm1, %v2096_v59, 0 }
  0x93   :  { %1144 = vmatpush1.bf16.msra.mxu0 %v1976_v32  ;;  %v254_v32 = vsub.s32 1, %v2197_v15  ;;  %v2084_v15 = vld [vmem:[%s2827_s5] sm:$0xff]  }
  0x94   :  { %1145 = vmatprep.subr.bf16.mxu0 %v1984_v33  ;;  %v251_v33 = vrot.slane %v246_v31, %v250_v30 }
  0x95   :  { %1401 = vmatpush1.bf16.msra.mxu1 %v2055_v62 }
  0x96   :  { %1402 = vmatprep.subr.bf16.mxu1 %v2060_v0 }
  0x97   :  { %1146 = vmatpush1.bf16.msra.mxu0 %v1982_v34  ;;  %v255_v34 = vrot.slane %v246_v31, %v254_v32 }
  0x98   :  { %1147 = vmatprep.subr.bf16.mxu0 %v1990_v35 }
  0x99   :  { %1403 = vmatpush1.bf16.msra.mxu1 %v2058_v1 }
  0x9a   :  { %1404 = vmatprep.subr.bf16.mxu1 %v2063_v3 }
  0x9b   :  { %1148 = vmatpush1.bf16.msra.mxu0 %v1988_v36 }
  0x9c   :  { %1149 = vmatprep.subr.bf16.mxu0 %v1996_v37 }
  0x9d   :  { %1405 = vmatpush1.bf16.msra.mxu1 %v2061_v4 }
  0x9e   :  { %1406 = vmatprep.subr.bf16.mxu1 %v2066_v5 }
  0x9f   :  { %1150 = vmatpush1.bf16.msra.mxu0 %v1994_v38 }
  0xa0   :  { %1151 = vmatprep.subr.bf16.mxu0 %v2002_v39 }
  0xa1   :  { %1407 = vmatpush1.bf16.msra.mxu1 %v2064_v6 }
  0xa2   :  { %1408 = vmatprep.subr.bf16.mxu1 %v2069_v7 }
  0xa3   :  { %1152 = vmatpush1.bf16.msra.mxu0 %v2000_v40 }
  0xa4   :  { %1153 = vmatprep.subr.bf16.mxu0 %v2008_v41 }
  0xa5   :  { %1409 = vmatpush1.bf16.msra.mxu1 %v2067_v8 }
  0xa6   :  { %1410 = vmatprep.subr.bf16.mxu1 %v2072_v9 }
  0xa7   :  { %1154 = vmatpush1.bf16.msra.mxu0 %v2006_v42 }
  0xa8   :  { %1155 = vmatprep.subr.bf16.mxu0 %v2014_v21 }
  0xa9   :  { %1411 = vmatpush1.bf16.msra.mxu1 %v2070_v10 }
  0xaa   :  { %1412 = vmatprep.subr.bf16.mxu1 %v2075_v63 }
  0xab   :  { %1156 = vmatpush1.bf16.msra.mxu0 %v2012_v43 }
  0xac   :  { %1157 = vmatprep.subr.bf16.mxu0 %v2020_v44 }
  0xad   :  { %1413 = vmatpush1.bf16.msra.mxu1 %v2073_v11  ;;  %v1787_v11 = vld [vmem:[%s2828_s6] ss:$0 sm:$0xff] }
  0xae   :  { %1414 = vmatprep.subr.bf16.mxu1 %v2078_v12 }
  0xaf   :  { %1158 = vmatpush1.bf16.msra.mxu0 %v2018_v45 }
  0xb0   :  { %1159 = vmatprep.subr.bf16.mxu0 %v2026_v46 }
  0xb1   :  { %1415 = vmatpush1.bf16.msra.mxu1 %v2076_v18 }
  0xb2   :  { %1416 = vmatprep.subr.bf16.mxu1 %v2081_v13 }
  0xb3   :  { %1160 = vmatpush1.bf16.msra.mxu0 %v2024_v47 }
  0xb4   :  { %1161 = vmatprep.subr.bf16.mxu0 %v2032_v48  ;;  %v2085_v48 = vld [vmem:[%s2827_s5 + $0x8] sm:$0xff]  }
  0xb5   :  { %1417 = vmatpush1.bf16.msra.mxu1 %v2079_v14 }
  0xb6   :  { %1785 = vmatprep.subr.msk.bf16.mxu1 %vm1387_vm1, %v1784_v17 }
  0xb7   :  { %1162 = vmatpush1.bf16.msra.mxu0 %v2030_v49  ;;  %v2086_v49 = vld [vmem:[%s2827_s5 + $0x10] sm:$0xff]  }
  0xb8   :  { %1163 = vmatprep.subr.bf16.mxu0 %v2038_v50  ;;  %v2087_v50 = vld [vmem:[%s2827_s5 + $0x18] sm:$0xff]  }
  0xb9   :  { %1419 = vmatpush1.bf16.msra.mxu1 %v1389_v20 }
  0xba   :  { %1552 = vmatprep.subr.bf16.mxu1 %v2122_v22 }
  0xbb   :  { %1164 = vmatpush1.bf16.msra.mxu0 %v2036_v54  ;;  %v2091_v54 = vld [vmem:[%s2827_s5 + $0x38] sm:$0xff]  }
  0xbc   :  { %1165 = vmatprep.subr.bf16.mxu0 %v2044_v55  ;;  %v2092_v55 = vld [vmem:[%s2827_s5 + $0x40] sm:$0xff]  }
  0xbf   :  { %1166 = vmatpush1.bf16.msra.mxu0 %v2042_v58  ;;  %v2095_v58 = vld [vmem:[%s2827_s5 + $0x58] sm:$0xff]  }
  0xc2   :  { %1168 = vmatmul.mubr.bf16.vlgmr.msra.gmra.mrb[0].mxu0 %v92_v61  ;;  %v1246_v61 = vld [vmem:[%s2826_s4] sm:$0x3]  ;;  %s2123_s4 = smov [#allocation2]  }
  0xc3   :  { %v1251_v62 = vrot.slane %v1246_v61, %v250_v30  ;;  %v1255_v0 = vrot.slane %v1246_v61, %v254_v32  ;;  %s1599_s28 = sshll.u32 %s2123_s4, 4  ;;  %s1600_s28 = int_to_ptr.vmem [resolvable:$true] %s1599_s28 }
  0xc4   :  { %s2097_s29 = scalar_lea.vmem %s1600_s28, 32  ;;  %p2102_p1 = scmp.lt.s32.totalorder %s1600_s28, %s1600_s28 }
  0xc5   :  { %p2098_p0 = scmp.ne.s32.totalorder %s1600_s28, %s2097_s29  ;;  %p2103_p2 = scmp.lt.s32.totalorder %s2097_s29, %s2097_s29 }
  0xc7   :  { %p2104_p3 = por %p2103_p2, %p2102_p1 }
  0xc9   :  { %p2105_p4 = pnand %p2104_p3, %p2098_p0 }
 0x11c   :  { %v1046_v23 = vpop.f32.mrb[0].mxu1 }
 0x11d   :  { %v1048_v2 = vpop.f32.mrb[1].mxu1  ;;  %v1047_v35 = vadd.f32 %v1046_v23, %v251_v33 }
 0x11e   :  { %v1050_v24 = vpop.f32.mrb[2].mxu1  ;;  %v1049_v36 = vadd.f32 %v1048_v2, %v255_v34 }
 0x11f   :  { %v1051_v25 = vpop.f32.mrb[3].mxu1 }
 0x15b   :  { %v1210_v26 = vpop.f32.mrb[4].mxu1 }
 0x15c   :  { %v1212_v27 = vpop.f32.mrb[5].mxu1 }
 0x15d   :  { %v1214_v28 = vpop.f32.mrb[6].mxu1 }
 0x15e   :  { %v1215_v29 = vpop.f32.mrb[7].mxu1 }
 0x195   :  { %v1169_v37 = vpop.f32.mrb[0].mxu0 }
 0x196   :  { %v1803_v38 = vadd.f32 %v1169_v37, %v1047_v35  ;;  %v1171_v39 = vpop.f32.mrb[1].mxu0 }
 0x197   :  { %v1806_v40 = vadd.f32 %v1171_v39, %v1049_v36  ;;  %v1173_v41 = vpop.f32.mrb[2].mxu0 }
 0x198   :  { %v1804_v42 = vadd.f32 %v1803_v38, %v1210_v26  ;;  %v1174_v21 = vpop.f32.mrb[3].mxu0 }
 0x199   :  { %v1807_v43 = vadd.f32 %v1806_v40, %v1212_v27 }
 0x19a   :  { %v1217_v44 = vmax.f32 %v1804_v42, 0.0 }
 0x19b   :  { %v1218_v45 = vmax.f32 %v1807_v43, 0.0 }
 0x19c   :  { %v1219_v47 = vpack.c.bf16 %v1217_v44, %v1217_v44 }
 0x19d   :  { %v1220_v46 = vpack.c.bf16 %v1218_v45, %v1218_v45 }
 0x19f   :  { %1786 = vmatprep.mubr.msk.bf16.mxu1 %vm1383_vm2, %v1220_v46 }
 0x1a0   :  { %1427 = vmatmul.mubr.bf16.vlgmr.msra.gmra.mrb[8].mxu1 %v1219_v47 }
 0x1a1   :  { %1553 = vmatpush1.bf16.msra.mxu1 %v2084_v15 }
 0x1a2   :  { %1554 = vmatprep.subr.bf16.mxu1 %v2122_v22 }
 0x1a5   :  { %1555 = vmatpush1.bf16.msra.mxu1 %v2085_v48 }
 0x1a6   :  { %1556 = vmatprep.subr.bf16.mxu1 %v2122_v22 }
 0x1a9   :  { %1557 = vmatpush1.bf16.msra.mxu1 %v2086_v49 }
 0x1aa   :  { %1558 = vmatprep.subr.bf16.mxu1 %v2122_v22 }
 0x1ad   :  { %1559 = vmatpush1.bf16.msra.mxu1 %v2087_v50 }
 0x1ae   :  { %1560 = vmatprep.subr.bf16.mxu1 %v2122_v22 }
 0x1b1   :  { %1561 = vmatpush1.bf16.msra.mxu1 %v2088_v51 }
 0x1b2   :  { %1562 = vmatprep.subr.bf16.mxu1 %v2122_v22 }
 0x1b5   :  { %1563 = vmatpush1.bf16.msra.mxu1 %v2089_v52 }
 0x1b6   :  { %1564 = vmatprep.subr.bf16.mxu1 %v2122_v22 }
 0x1b9   :  { %1565 = vmatpush1.bf16.msra.mxu1 %v2090_v53 }
 0x1ba   :  { %1566 = vmatprep.subr.bf16.mxu1 %v2122_v22 }
 0x1bd   :  { %1567 = vmatpush1.bf16.msra.mxu1 %v2091_v54 }
 0x1be   :  { %1568 = vmatprep.subr.bf16.mxu1 %v2122_v22 }
 0x1c1   :  { %1569 = vmatpush1.bf16.msra.mxu1 %v2092_v55 }
 0x1c2   :  { %1570 = vmatprep.subr.bf16.mxu1 %v2122_v22 }
 0x1c5   :  { %1571 = vmatpush1.bf16.msra.mxu1 %v2093_v56 }
 0x1c6   :  { %1572 = vmatprep.subr.bf16.mxu1 %v2122_v22 }
 0x1c9   :  { %1573 = vmatpush1.bf16.msra.mxu1 %v2094_v57 }
 0x1ca   :  { %1574 = vmatprep.subr.bf16.mxu1 %v2122_v22 }
 0x1cd   :  { %1575 = vmatpush1.bf16.msra.mxu1 %v2095_v58 }
 0x1ce   :  { %1576 = vmatprep.subr.bf16.mxu1 %v2122_v22 }
 0x1d1   :  { %1577 = vmatpush1.bf16.msra.mxu1 %v1550_v60 }
 0x273   :  { %v1428_v1 = vpop.f32.mrb[8].mxu1 }
 0x274   :  { %v1429_v3 = vadd.f32 %v1428_v1, %v1251_v62  ;;  %v1430_v4 = vpop.f32.mrb[9].mxu1 }
 0x275   :  { %v1431_v5 = vadd.f32 %v1430_v4, %v1255_v0  ;;  %v1432_v6 = vpop.f32.mrb[10].mxu1 }
 0x276   :  { %v1435_v7 = vmax.f32 %v1429_v3, 0.0  ;;  %v1433_v8 = vpop.f32.mrb[11].mxu1 }
 0x277   :  { %v1436_v9 = vmax.f32 %v1431_v5, 0.0 }
 0x278   :  { %v1437_v63 = vpack.c.bf16 %v1435_v7, %v1435_v7 }
 0x279   :  { %v1438_v10 = vpack.c.bf16 %v1436_v9, %v1436_v9 }
 0x27b   :  { %1801 = vmatprep.mubr.msk.bf16.mxu1 %vm1383_vm2, %v1438_v10 }
 0x27c   :  { %1585 = vmatmul.mubr.bf16.vlgmr.msra.gmra.mrb[12].mxu1 %v1437_v63 }
 0x34f   :  { %v1586_v18 = vpop.f32.mrb[12].mxu1 }
 0x350   :  { %v1587_v12 = vadd.f32 %v1787_v11, %v1586_v18  ;;  %v1588_v13 = vpop.f32.mrb[13].mxu1 }
 0x351   :  { %v1589_v14 = vpop.f32.mrb[14].mxu1 }
 0x352   :  { %1592 = vst [vmem:[#allocation2] sm:$0x3] %v1587_v12  ;;  %v1590_v16 = vpop.f32.mrb[15].mxu1 }
 0x353   :  { %2108 = shalt.err (!%p2105_p4)
}
 0x354   :  { %s2109_s6 = scalar_lea.hbm %s2829_s7, 32 }
 0x355   :  { %p2110_p5 = scmp.ne.s32.totalorder %s2829_s7, %s2109_s6  ;;  %p2113_p6 = scmp.lt.u32.totalorder %s2109_s6, %s2829_s7 }
 0x357   :  { %p2115_p7 = pnand %p2113_p6, %p2110_p5 }
 0x359   :  { %2118 = shalt.err (!%p2115_p7)
}
 0x35a   :  { %1602 = dma.vmem_to_hbm [thread:$0]  %s1600_s28, 32, %s2829_s7, [#allocation3]  }
 0x35b   :  { %2119 = dma.done.wait [#allocation3], 32  }
 0x35c   :  { %2120 = vsyncadd [#allocation3], 4294967264 }
 0x35d   :  { %1606 = vsyncpa [#allocation3], 1 }

</bundles_post_ra>
